<compile_context>
chip_gen: v7x
topology: tpu7x:2x2x1
jax: 0.10.0
libtpu: 0.0.40
codegen_flags: <defaults>
</compile_context>

<pallas_src>
import functools

import jax
import jax.numpy as jnp
import numpy as np
from jax.experimental import pallas as pl
from jax.experimental.pallas import tpu as pltpu

KERNEL_SIZE = 7
PAD = KERNEL_SIZE // 2  # 3


def _tree_sum(terms):
    """Balanced pairwise sum -> log-depth add chains (independent accumulators)."""
    terms = list(terms)
    while len(terms) > 1:
        nxt = [terms[i] + terms[i + 1] for i in range(0, len(terms) - 1, 2)]
        if len(terms) % 2:
            nxt.append(terms[-1])
        terms = nxt
    return terms[0]


def _spatial_attention_kernel(w_ref, m_ref, x_ref, o_ref, *, H, W):
    # w_ref : SMEM (2*7*7,) f32 conv weight, index = c*49 + kh*7 + kw
    # m_ref : VMEM (14, H*W) f32 masks: rows 0..6  = column masks (dw = -3..3)
    #                                   rows 7..13 = row masks    (dh = -3..3)
    # x_ref : VMEM (bN, C, H*W) input block
    # o_ref : VMEM (bN, C, H*W) output block
    HW = H * W

    x = x_ref[...].astype(jnp.float32)           # (bN, C, HW)
    avg = jnp.mean(x, axis=1)                    # (bN, HW)
    mx = jnp.max(x, axis=1)                      # (bN, HW)

    masks = m_ref[...]                           # (14, HW)

    # Column-shifted + column-masked pooled planes, kept register-resident.
    # shifted[c][kw][b, h*W + w] == pooled_c[b, h, w + (kw - PAD)]  (0 outside).
    planes = (avg, mx)
    shifted = []
    for c in range(2):
        per_c = []
        for kw in range(KERNEL_SIZE):
            dw = kw - PAD
            p = planes[c]
            if dw != 0:
                p = pltpu.roll(p, shift=(-dw) % HW, axis=1)
            per_c.append(p * masks[kw:kw + 1, :])
        shifted.append(per_c)

    # One row-roll per kh: the row shift is linear, so roll the weighted sum
    # over (channel, kw) once instead of once per tap.
    row_terms = []
    for kh in range(KERNEL_SIZE):
        dh = kh - PAD
        taps = []
        for c in range(2):
            base = c * KERNEL_SIZE * KERNEL_SIZE + kh * KERNEL_SIZE
            for kw in range(KERNEL_SIZE):
                taps.append(w_ref[base + kw] * shifted[c][kw])
        s = _tree_sum(taps)                       # (bN, HW)
        if dh != 0:
            s = pltpu.roll(s, shift=(-dh * W) % HW, axis=1)
        row_terms.append(s * masks[KERNEL_SIZE + kh:KERNEL_SIZE + kh + 1, :])

    attn = jax.nn.sigmoid(_tree_sum(row_terms))   # (bN, HW)
    o_ref[...] = (x * attn[:, None, :]).astype(o_ref.dtype)


def _choose_block_batch(N, C, HW, itemsize):
    """Batch elements per grid step: amortize per-step overhead with bigger DMA
    tiles, but keep 2 input + 2 output in-flight block copies well inside the
    default scoped-VMEM budget, and (when possible) leave >=2 grid steps so
    both v7x TensorCores get work."""
    per_batch = C * HW * itemsize
    budget = 4 * 1024 * 1024                     # bytes for pipelined block copies
    bn = max(1, min(N, budget // max(1, 4 * per_batch)))
    if N > 1:
        bn = min(bn, max(1, N // 2))             # keep at least 2 grid steps
    while N % bn:                                # keep the grid exact
        bn -= 1
    return bn


def spatial_attention(x, conv_weight):
    """x: (N, C, H, W); conv_weight: (1, 2, 7, 7) (nn.Conv2d(2, 1, 7, bias=False))."""
    N, C, H, W = x.shape
    HW = H * W

    x_flat = x.reshape(N, C, HW)                            # free HBM reshape
    w_flat = conv_weight.reshape(-1).astype(jnp.float32)    # (98,)

    # Precompute 0/1 border masks for the zero "SAME" padding (host-side, static).
    p = np.arange(HW)
    col = p % W
    row = p // W
    masks_np = np.empty((2 * KERNEL_SIZE, HW), dtype=np.float32)
    for k in range(KERNEL_SIZE):
        d = k - PAD
        masks_np[k] = ((col + d >= 0) & (col + d < W)).astype(np.float32)
        masks_np[KERNEL_SIZE + k] = ((row + d >= 0) & (row + d < H)).astype(np.float32)
    masks = jnp.asarray(masks_np)

    bN = _choose_block_batch(N, C, HW, x.dtype.itemsize)
    kernel = functools.partial(_spatial_attention_kernel, H=H, W=W)

    out = pl.pallas_call(
        kernel,
        out_shape=jax.ShapeDtypeStruct((N, C, HW), x.dtype),
        grid_spec=pltpu.PrefetchScalarGridSpec(
            num_scalar_prefetch=0,
            grid=(N // bN,),
            in_specs=[
                pl.BlockSpec(memory_space=pltpu.SMEM),                   # conv weights
                pl.BlockSpec((2 * KERNEL_SIZE, HW), lambda b: (0, 0)),   # border masks
                pl.BlockSpec((bN, C, HW), lambda b: (b, 0, 0)),          # x block
            ],
            out_specs=pl.BlockSpec((bN, C, HW), lambda b: (b, 0, 0)),
        ),
        compiler_params=pltpu.CompilerParams(
            dimension_semantics=("parallel",),
        ),
    )(w_flat, masks, x_flat)
    return out.reshape(N, C, H, W)


def spatial_attention_reference(x, conv_weight):
    avg = jnp.mean(x, axis=1, keepdims=True)
    mx = jnp.max(x, axis=1, keepdims=True)
    inp = jnp.concatenate([avg, mx], axis=1)
    attn = jax.lax.conv_general_dilated(
        inp, conv_weight, window_strides=(1, 1), padding="SAME",
        dimension_numbers=("NCHW", "OIHW", "NCHW"),
        precision=jax.lax.Precision.HIGHEST)
    return x * jax.nn.sigmoid(attn)


if __name__ == "__main__":
    key = jax.random.PRNGKey(0)
    kx, kw = jax.random.split(key)

    N, C, H, W = 2, 4, 16, 16
    x = jax.random.normal(kx, (N, C, H, W), dtype=jnp.float32)
    # Deterministic synthetic conv weight (shape matches nn.Conv2d(2, 1, 7, bias=False)).
    conv_weight = 0.1 * jax.random.normal(kw, (1, 2, KERNEL_SIZE, KERNEL_SIZE),
                                          dtype=jnp.float32)

    out = spatial_attention(x, conv_weight)
    out = jax.block_until_ready(out)

    ref = spatial_attention_reference(x, conv_weight)
    np.testing.assert_allclose(np.asarray(out), np.asarray(ref), rtol=1e-5, atol=1e-5)

    print("KERNEL_OK")
</pallas_src>

<mosaic_0001>
module attributes {stable_mosaic.version = 11 : i64} {
  func.func @_spatial_attention_kernel(%arg0: i32, %arg1: memref<98xf32, #tpu.memory_space<smem>>, %arg2: memref<14x256xf32, #tpu.memory_space<vmem>>, %arg3: memref<1x4x256xf32, #tpu.memory_space<vmem>>, %arg4: memref<1x4x256xf32, #tpu.memory_space<vmem>>) attributes {dimension_semantics = [#tpu.dimension_semantics<parallel>], iteration_bounds = array<i64: 2>, scalar_prefetch = 0 : i64, scratch_operands = 0 : i64, tpu.core_type = #tpu.core_type<tc>, window_params = [{transform_indices = @transform_0, window_bounds = array<i64: 98>}, {pipeline_mode = #tpu.pipeline_mode<synchronous>, transform_indices = @transform_1, window_bounds = array<i64: 14, 256>}, {transform_indices = @transform_2, window_bounds = array<i64: 1, 4, 256>}, {transform_indices = @transform_3, window_bounds = array<i64: 1, 4, 256>}]} {
    %c0 = arith.constant 0 : index
    %c0_0 = arith.constant 0 : index
    %c0_1 = arith.constant 0 : index
    %0 = vector.load %arg3[%c0, %c0_0, %c0_1] : memref<1x4x256xf32, #tpu.memory_space<vmem>>, vector<1x4x256xf32>
    %cst = arith.constant dense<0.000000e+00> : vector<1x256xf32>
    %1 = vector.multi_reduction <add>, %0, %cst [1] : vector<1x4x256xf32> to vector<1x256xf32>
    %cst_2 = arith.constant 4.000000e+00 : f32
    %2 = vector.broadcast %cst_2 : f32 to vector<1x256xf32>
    %3 = arith.divf %1, %2 : vector<1x256xf32>
    %cst_3 = arith.constant dense<0xFF800000> : vector<1x256xf32>
    %4 = vector.multi_reduction <maximumf>, %0, %cst_3 [1] : vector<1x4x256xf32> to vector<1x256xf32>
    %c0_4 = arith.constant 0 : index
    %c0_5 = arith.constant 0 : index
    %5 = vector.load %arg2[%c0_4, %c0_5] : memref<14x256xf32, #tpu.memory_space<vmem>>, vector<14x256xf32>
    %c3_i32 = arith.constant 3 : i32
    %6 = tpu.dynamic_rotate %3 by %c3_i32 dim 1 : vector<1x256xf32>, i32 -> vector<1x256xf32>
    %7 = vector.extract_strided_slice %5 {offsets = [0, 0], sizes = [1, 256], strides = [1, 1]} : vector<14x256xf32> to vector<1x256xf32>
    %8 = arith.mulf %6, %7 : vector<1x256xf32>
    %c2_i32 = arith.constant 2 : i32
    %9 = tpu.dynamic_rotate %3 by %c2_i32 dim 1 : vector<1x256xf32>, i32 -> vector<1x256xf32>
    %10 = vector.extract_strided_slice %5 {offsets = [1, 0], sizes = [1, 256], strides = [1, 1]} : vector<14x256xf32> to vector<1x256xf32>
    %11 = arith.mulf %9, %10 : vector<1x256xf32>
    %c1_i32 = arith.constant 1 : i32
    %12 = tpu.dynamic_rotate %3 by %c1_i32 dim 1 : vector<1x256xf32>, i32 -> vector<1x256xf32>
    %13 = vector.extract_strided_slice %5 {offsets = [2, 0], sizes = [1, 256], strides = [1, 1]} : vector<14x256xf32> to vector<1x256xf32>
    %14 = arith.mulf %12, %13 : vector<1x256xf32>
    %15 = vector.extract_strided_slice %5 {offsets = [3, 0], sizes = [1, 256], strides = [1, 1]} : vector<14x256xf32> to vector<1x256xf32>
    %16 = arith.mulf %3, %15 : vector<1x256xf32>
    %c255_i32 = arith.constant 255 : i32
    %17 = tpu.dynamic_rotate %3 by %c255_i32 dim 1 : vector<1x256xf32>, i32 -> vector<1x256xf32>
    %18 = vector.extract_strided_slice %5 {offsets = [4, 0], sizes = [1, 256], strides = [1, 1]} : vector<14x256xf32> to vector<1x256xf32>
    %19 = arith.mulf %17, %18 : vector<1x256xf32>
    %c254_i32 = arith.constant 254 : i32
    %20 = tpu.dynamic_rotate %3 by %c254_i32 dim 1 : vector<1x256xf32>, i32 -> vector<1x256xf32>
    %21 = vector.extract_strided_slice %5 {offsets = [5, 0], sizes = [1, 256], strides = [1, 1]} : vector<14x256xf32> to vector<1x256xf32>
    %22 = arith.mulf %20, %21 : vector<1x256xf32>
    %c253_i32 = arith.constant 253 : i32
    %23 = tpu.dynamic_rotate %3 by %c253_i32 dim 1 : vector<1x256xf32>, i32 -> vector<1x256xf32>
    %24 = vector.extract_strided_slice %5 {offsets = [6, 0], sizes = [1, 256], strides = [1, 1]} : vector<14x256xf32> to vector<1x256xf32>
    %25 = arith.mulf %23, %24 : vector<1x256xf32>
    %c3_i32_6 = arith.constant 3 : i32
    %26 = tpu.dynamic_rotate %4 by %c3_i32_6 dim 1 : vector<1x256xf32>, i32 -> vector<1x256xf32>
    %27 = vector.extract_strided_slice %5 {offsets = [0, 0], sizes = [1, 256], strides = [1, 1]} : vector<14x256xf32> to vector<1x256xf32>
    %28 = arith.mulf %26, %27 : vector<1x256xf32>
    %c2_i32_7 = arith.constant 2 : i32
    %29 = tpu.dynamic_rotate %4 by %c2_i32_7 dim 1 : vector<1x256xf32>, i32 -> vector<1x256xf32>
    %30 = vector.extract_strided_slice %5 {offsets = [1, 0], sizes = [1, 256], strides = [1, 1]} : vector<14x256xf32> to vector<1x256xf32>
    %31 = arith.mulf %29, %30 : vector<1x256xf32>
    %c1_i32_8 = arith.constant 1 : i32
    %32 = tpu.dynamic_rotate %4 by %c1_i32_8 dim 1 : vector<1x256xf32>, i32 -> vector<1x256xf32>
    %33 = vector.extract_strided_slice %5 {offsets = [2, 0], sizes = [1, 256], strides = [1, 1]} : vector<14x256xf32> to vector<1x256xf32>
    %34 = arith.mulf %32, %33 : vector<1x256xf32>
    %35 = vector.extract_strided_slice %5 {offsets = [3, 0], sizes = [1, 256], strides = [1, 1]} : vector<14x256xf32> to vector<1x256xf32>
    %36 = arith.mulf %4, %35 : vector<1x256xf32>
    %c255_i32_9 = arith.constant 255 : i32
    %37 = tpu.dynamic_rotate %4 by %c255_i32_9 dim 1 : vector<1x256xf32>, i32 -> vector<1x256xf32>
    %38 = vector.extract_strided_slice %5 {offsets = [4, 0], sizes = [1, 256], strides = [1, 1]} : vector<14x256xf32> to vector<1x256xf32>
    %39 = arith.mulf %37, %38 : vector<1x256xf32>
    %c254_i32_10 = arith.constant 254 : i32
    %40 = tpu.dynamic_rotate %4 by %c254_i32_10 dim 1 : vector<1x256xf32>, i32 -> vector<1x256xf32>
    %41 = vector.extract_strided_slice %5 {offsets = [5, 0], sizes = [1, 256], strides = [1, 1]} : vector<14x256xf32> to vector<1x256xf32>
    %42 = arith.mulf %40, %41 : vector<1x256xf32>
    %c253_i32_11 = arith.constant 253 : i32
    %43 = tpu.dynamic_rotate %4 by %c253_i32_11 dim 1 : vector<1x256xf32>, i32 -> vector<1x256xf32>
    %44 = vector.extract_strided_slice %5 {offsets = [6, 0], sizes = [1, 256], strides = [1, 1]} : vector<14x256xf32> to vector<1x256xf32>
    %45 = arith.mulf %43, %44 : vector<1x256xf32>
    %c0_12 = arith.constant 0 : index
    %46 = memref.load %arg1[%c0_12] : memref<98xf32, #tpu.memory_space<smem>>
    %47 = vector.broadcast %46 : f32 to vector<1x256xf32>
    %48 = arith.mulf %47, %8 : vector<1x256xf32>
    %c1 = arith.constant 1 : index
    %49 = memref.load %arg1[%c1] : memref<98xf32, #tpu.memory_space<smem>>
    %50 = vector.broadcast %49 : f32 to vector<1x256xf32>
    %51 = arith.mulf %50, %11 : vector<1x256xf32>
    %c2 = arith.constant 2 : index
    %52 = memref.load %arg1[%c2] : memref<98xf32, #tpu.memory_space<smem>>
    %53 = vector.broadcast %52 : f32 to vector<1x256xf32>
    %54 = arith.mulf %53, %14 : vector<1x256xf32>
    %c3 = arith.constant 3 : index
    %55 = memref.load %arg1[%c3] : memref<98xf32, #tpu.memory_space<smem>>
    %56 = vector.broadcast %55 : f32 to vector<1x256xf32>
    %57 = arith.mulf %56, %16 : vector<1x256xf32>
    %c4 = arith.constant 4 : index
    %58 = memref.load %arg1[%c4] : memref<98xf32, #tpu.memory_space<smem>>
    %59 = vector.broadcast %58 : f32 to vector<1x256xf32>
    %60 = arith.mulf %59, %19 : vector<1x256xf32>
    %c5 = arith.constant 5 : index
    %61 = memref.load %arg1[%c5] : memref<98xf32, #tpu.memory_space<smem>>
    %62 = vector.broadcast %61 : f32 to vector<1x256xf32>
    %63 = arith.mulf %62, %22 : vector<1x256xf32>
    %c6 = arith.constant 6 : index
    %64 = memref.load %arg1[%c6] : memref<98xf32, #tpu.memory_space<smem>>
    %65 = vector.broadcast %64 : f32 to vector<1x256xf32>
    %66 = arith.mulf %65, %25 : vector<1x256xf32>
    %c49 = arith.constant 49 : index
    %67 = memref.load %arg1[%c49] : memref<98xf32, #tpu.memory_space<smem>>
    %68 = vector.broadcast %67 : f32 to vector<1x256xf32>
    %69 = arith.mulf %68, %28 : vector<1x256xf32>
    %c50 = arith.constant 50 : index
    %70 = memref.load %arg1[%c50] : memref<98xf32, #tpu.memory_space<smem>>
    %71 = vector.broadcast %70 : f32 to vector<1x256xf32>
    %72 = arith.mulf %71, %31 : vector<1x256xf32>
    %c51 = arith.constant 51 : index
    %73 = memref.load %arg1[%c51] : memref<98xf32, #tpu.memory_space<smem>>
    %74 = vector.broadcast %73 : f32 to vector<1x256xf32>
    %75 = arith.mulf %74, %34 : vector<1x256xf32>
    %c52 = arith.constant 52 : index
    %76 = memref.load %arg1[%c52] : memref<98xf32, #tpu.memory_space<smem>>
    %77 = vector.broadcast %76 : f32 to vector<1x256xf32>
    %78 = arith.mulf %77, %36 : vector<1x256xf32>
    %c53 = arith.constant 53 : index
    %79 = memref.load %arg1[%c53] : memref<98xf32, #tpu.memory_space<smem>>
    %80 = vector.broadcast %79 : f32 to vector<1x256xf32>
    %81 = arith.mulf %80, %39 : vector<1x256xf32>
    %c54 = arith.constant 54 : index
    %82 = memref.load %arg1[%c54] : memref<98xf32, #tpu.memory_space<smem>>
    %83 = vector.broadcast %82 : f32 to vector<1x256xf32>
    %84 = arith.mulf %83, %42 : vector<1x256xf32>
    %c55 = arith.constant 55 : index
    %85 = memref.load %arg1[%c55] : memref<98xf32, #tpu.memory_space<smem>>
    %86 = vector.broadcast %85 : f32 to vector<1x256xf32>
    %87 = arith.mulf %86, %45 : vector<1x256xf32>
    %88 = arith.addf %48, %51 : vector<1x256xf32>
    %89 = arith.addf %54, %57 : vector<1x256xf32>
    %90 = arith.addf %60, %63 : vector<1x256xf32>
    %91 = arith.addf %66, %69 : vector<1x256xf32>
    %92 = arith.addf %72, %75 : vector<1x256xf32>
    %93 = arith.addf %78, %81 : vector<1x256xf32>
    %94 = arith.addf %84, %87 : vector<1x256xf32>
    %95 = arith.addf %88, %89 : vector<1x256xf32>
    %96 = arith.addf %90, %91 : vector<1x256xf32>
    %97 = arith.addf %92, %93 : vector<1x256xf32>
    %98 = arith.addf %95, %96 : vector<1x256xf32>
    %99 = arith.addf %97, %94 : vector<1x256xf32>
    %100 = arith.addf %98, %99 : vector<1x256xf32>
    %c48_i32 = arith.constant 48 : i32
    %101 = tpu.dynamic_rotate %100 by %c48_i32 dim 1 : vector<1x256xf32>, i32 -> vector<1x256xf32>
    %102 = vector.extract_strided_slice %5 {offsets = [7, 0], sizes = [1, 256], strides = [1, 1]} : vector<14x256xf32> to vector<1x256xf32>
    %103 = arith.mulf %101, %102 : vector<1x256xf32>
    %c7 = arith.constant 7 : index
    %104 = memref.load %arg1[%c7] : memref<98xf32, #tpu.memory_space<smem>>
    %105 = vector.broadcast %104 : f32 to vector<1x256xf32>
    %106 = arith.mulf %105, %8 : vector<1x256xf32>
    %c8 = arith.constant 8 : index
    %107 = memref.load %arg1[%c8] : memref<98xf32, #tpu.memory_space<smem>>
    %108 = vector.broadcast %107 : f32 to vector<1x256xf32>
    %109 = arith.mulf %108, %11 : vector<1x256xf32>
    %c9 = arith.constant 9 : index
    %110 = memref.load %arg1[%c9] : memref<98xf32, #tpu.memory_space<smem>>
    %111 = vector.broadcast %110 : f32 to vector<1x256xf32>
    %112 = arith.mulf %111, %14 : vector<1x256xf32>
    %c10 = arith.constant 10 : index
    %113 = memref.load %arg1[%c10] : memref<98xf32, #tpu.memory_space<smem>>
    %114 = vector.broadcast %113 : f32 to vector<1x256xf32>
    %115 = arith.mulf %114, %16 : vector<1x256xf32>
    %c11 = arith.constant 11 : index
    %116 = memref.load %arg1[%c11] : memref<98xf32, #tpu.memory_space<smem>>
    %117 = vector.broadcast %116 : f32 to vector<1x256xf32>
    %118 = arith.mulf %117, %19 : vector<1x256xf32>
    %c12 = arith.constant 12 : index
    %119 = memref.load %arg1[%c12] : memref<98xf32, #tpu.memory_space<smem>>
    %120 = vector.broadcast %119 : f32 to vector<1x256xf32>
    %121 = arith.mulf %120, %22 : vector<1x256xf32>
    %c13 = arith.constant 13 : index
    %122 = memref.load %arg1[%c13] : memref<98xf32, #tpu.memory_space<smem>>
    %123 = vector.broadcast %122 : f32 to vector<1x256xf32>
    %124 = arith.mulf %123, %25 : vector<1x256xf32>
    %c56 = arith.constant 56 : index
    %125 = memref.load %arg1[%c56] : memref<98xf32, #tpu.memory_space<smem>>
    %126 = vector.broadcast %125 : f32 to vector<1x256xf32>
    %127 = arith.mulf %126, %28 : vector<1x256xf32>
    %c57 = arith.constant 57 : index
    %128 = memref.load %arg1[%c57] : memref<98xf32, #tpu.memory_space<smem>>
    %129 = vector.broadcast %128 : f32 to vector<1x256xf32>
    %130 = arith.mulf %129, %31 : vector<1x256xf32>
    %c58 = arith.constant 58 : index
    %131 = memref.load %arg1[%c58] : memref<98xf32, #tpu.memory_space<smem>>
    %132 = vector.broadcast %131 : f32 to vector<1x256xf32>
    %133 = arith.mulf %132, %34 : vector<1x256xf32>
    %c59 = arith.constant 59 : index
    %134 = memref.load %arg1[%c59] : memref<98xf32, #tpu.memory_space<smem>>
    %135 = vector.broadcast %134 : f32 to vector<1x256xf32>
    %136 = arith.mulf %135, %36 : vector<1x256xf32>
    %c60 = arith.constant 60 : index
    %137 = memref.load %arg1[%c60] : memref<98xf32, #tpu.memory_space<smem>>
    %138 = vector.broadcast %137 : f32 to vector<1x256xf32>
    %139 = arith.mulf %138, %39 : vector<1x256xf32>
    %c61 = arith.constant 61 : index
    %140 = memref.load %arg1[%c61] : memref<98xf32, #tpu.memory_space<smem>>
    %141 = vector.broadcast %140 : f32 to vector<1x256xf32>
    %142 = arith.mulf %141, %42 : vector<1x256xf32>
    %c62 = arith.constant 62 : index
    %143 = memref.load %arg1[%c62] : memref<98xf32, #tpu.memory_space<smem>>
    %144 = vector.broadcast %143 : f32 to vector<1x256xf32>
    %145 = arith.mulf %144, %45 : vector<1x256xf32>
    %146 = arith.addf %106, %109 : vector<1x256xf32>
    %147 = arith.addf %112, %115 : vector<1x256xf32>
    %148 = arith.addf %118, %121 : vector<1x256xf32>
    %149 = arith.addf %124, %127 : vector<1x256xf32>
    %150 = arith.addf %130, %133 : vector<1x256xf32>
    %151 = arith.addf %136, %139 : vector<1x256xf32>
    %152 = arith.addf %142, %145 : vector<1x256xf32>
    %153 = arith.addf %146, %147 : vector<1x256xf32>
    %154 = arith.addf %148, %149 : vector<1x256xf32>
    %155 = arith.addf %150, %151 : vector<1x256xf32>
    %156 = arith.addf %153, %154 : vector<1x256xf32>
    %157 = arith.addf %155, %152 : vector<1x256xf32>
    %158 = arith.addf %156, %157 : vector<1x256xf32>
    %c32_i32 = arith.constant 32 : i32
    %159 = tpu.dynamic_rotate %158 by %c32_i32 dim 1 : vector<1x256xf32>, i32 -> vector<1x256xf32>
    %160 = vector.extract_strided_slice %5 {offsets = [8, 0], sizes = [1, 256], strides = [1, 1]} : vector<14x256xf32> to vector<1x256xf32>
    %161 = arith.mulf %159, %160 : vector<1x256xf32>
    %c14 = arith.constant 14 : index
    %162 = memref.load %arg1[%c14] : memref<98xf32, #tpu.memory_space<smem>>
    %163 = vector.broadcast %162 : f32 to vector<1x256xf32>
    %164 = arith.mulf %163, %8 : vector<1x256xf32>
    %c15 = arith.constant 15 : index
    %165 = memref.load %arg1[%c15] : memref<98xf32, #tpu.memory_space<smem>>
    %166 = vector.broadcast %165 : f32 to vector<1x256xf32>
    %167 = arith.mulf %166, %11 : vector<1x256xf32>
    %c16 = arith.constant 16 : index
    %168 = memref.load %arg1[%c16] : memref<98xf32, #tpu.memory_space<smem>>
    %169 = vector.broadcast %168 : f32 to vector<1x256xf32>
    %170 = arith.mulf %169, %14 : vector<1x256xf32>
    %c17 = arith.constant 17 : index
    %171 = memref.load %arg1[%c17] : memref<98xf32, #tpu.memory_space<smem>>
    %172 = vector.broadcast %171 : f32 to vector<1x256xf32>
    %173 = arith.mulf %172, %16 : vector<1x256xf32>
    %c18 = arith.constant 18 : index
    %174 = memref.load %arg1[%c18] : memref<98xf32, #tpu.memory_space<smem>>
    %175 = vector.broadcast %174 : f32 to vector<1x256xf32>
    %176 = arith.mulf %175, %19 : vector<1x256xf32>
    %c19 = arith.constant 19 : index
    %177 = memref.load %arg1[%c19] : memref<98xf32, #tpu.memory_space<smem>>
    %178 = vector.broadcast %177 : f32 to vector<1x256xf32>
    %179 = arith.mulf %178, %22 : vector<1x256xf32>
    %c20 = arith.constant 20 : index
    %180 = memref.load %arg1[%c20] : memref<98xf32, #tpu.memory_space<smem>>
    %181 = vector.broadcast %180 : f32 to vector<1x256xf32>
    %182 = arith.mulf %181, %25 : vector<1x256xf32>
    %c63 = arith.constant 63 : index
    %183 = memref.load %arg1[%c63] : memref<98xf32, #tpu.memory_space<smem>>
    %184 = vector.broadcast %183 : f32 to vector<1x256xf32>
    %185 = arith.mulf %184, %28 : vector<1x256xf32>
    %c64 = arith.constant 64 : index
    %186 = memref.load %arg1[%c64] : memref<98xf32, #tpu.memory_space<smem>>
    %187 = vector.broadcast %186 : f32 to vector<1x256xf32>
    %188 = arith.mulf %187, %31 : vector<1x256xf32>
    %c65 = arith.constant 65 : index
    %189 = memref.load %arg1[%c65] : memref<98xf32, #tpu.memory_space<smem>>
    %190 = vector.broadcast %189 : f32 to vector<1x256xf32>
    %191 = arith.mulf %190, %34 : vector<1x256xf32>
    %c66 = arith.constant 66 : index
    %192 = memref.load %arg1[%c66] : memref<98xf32, #tpu.memory_space<smem>>
    %193 = vector.broadcast %192 : f32 to vector<1x256xf32>
    %194 = arith.mulf %193, %36 : vector<1x256xf32>
    %c67 = arith.constant 67 : index
    %195 = memref.load %arg1[%c67] : memref<98xf32, #tpu.memory_space<smem>>
    %196 = vector.broadcast %195 : f32 to vector<1x256xf32>
    %197 = arith.mulf %196, %39 : vector<1x256xf32>
    %c68 = arith.constant 68 : index
    %198 = memref.load %arg1[%c68] : memref<98xf32, #tpu.memory_space<smem>>
    %199 = vector.broadcast %198 : f32 to vector<1x256xf32>
    %200 = arith.mulf %199, %42 : vector<1x256xf32>
    %c69 = arith.constant 69 : index
    %201 = memref.load %arg1[%c69] : memref<98xf32, #tpu.memory_space<smem>>
    %202 = vector.broadcast %201 : f32 to vector<1x256xf32>
    %203 = arith.mulf %202, %45 : vector<1x256xf32>
    %204 = arith.addf %164, %167 : vector<1x256xf32>
    %205 = arith.addf %170, %173 : vector<1x256xf32>
    %206 = arith.addf %176, %179 : vector<1x256xf32>
    %207 = arith.addf %182, %185 : vector<1x256xf32>
    %208 = arith.addf %188, %191 : vector<1x256xf32>
    %209 = arith.addf %194, %197 : vector<1x256xf32>
    %210 = arith.addf %200, %203 : vector<1x256xf32>
    %211 = arith.addf %204, %205 : vector<1x256xf32>
    %212 = arith.addf %206, %207 : vector<1x256xf32>
    %213 = arith.addf %208, %209 : vector<1x256xf32>
    %214 = arith.addf %211, %212 : vector<1x256xf32>
    %215 = arith.addf %213, %210 : vector<1x256xf32>
    %216 = arith.addf %214, %215 : vector<1x256xf32>
    %c16_i32 = arith.constant 16 : i32
    %217 = tpu.dynamic_rotate %216 by %c16_i32 dim 1 : vector<1x256xf32>, i32 -> vector<1x256xf32>
    %218 = vector.extract_strided_slice %5 {offsets = [9, 0], sizes = [1, 256], strides = [1, 1]} : vector<14x256xf32> to vector<1x256xf32>
    %219 = arith.mulf %217, %218 : vector<1x256xf32>
    %c21 = arith.constant 21 : index
    %220 = memref.load %arg1[%c21] : memref<98xf32, #tpu.memory_space<smem>>
    %221 = vector.broadcast %220 : f32 to vector<1x256xf32>
    %222 = arith.mulf %221, %8 : vector<1x256xf32>
    %c22 = arith.constant 22 : index
    %223 = memref.load %arg1[%c22] : memref<98xf32, #tpu.memory_space<smem>>
    %224 = vector.broadcast %223 : f32 to vector<1x256xf32>
    %225 = arith.mulf %224, %11 : vector<1x256xf32>
    %c23 = arith.constant 23 : index
    %226 = memref.load %arg1[%c23] : memref<98xf32, #tpu.memory_space<smem>>
    %227 = vector.broadcast %226 : f32 to vector<1x256xf32>
    %228 = arith.mulf %227, %14 : vector<1x256xf32>
    %c24 = arith.constant 24 : index
    %229 = memref.load %arg1[%c24] : memref<98xf32, #tpu.memory_space<smem>>
    %230 = vector.broadcast %229 : f32 to vector<1x256xf32>
    %231 = arith.mulf %230, %16 : vector<1x256xf32>
    %c25 = arith.constant 25 : index
    %232 = memref.load %arg1[%c25] : memref<98xf32, #tpu.memory_space<smem>>
    %233 = vector.broadcast %232 : f32 to vector<1x256xf32>
    %234 = arith.mulf %233, %19 : vector<1x256xf32>
    %c26 = arith.constant 26 : index
    %235 = memref.load %arg1[%c26] : memref<98xf32, #tpu.memory_space<smem>>
    %236 = vector.broadcast %235 : f32 to vector<1x256xf32>
    %237 = arith.mulf %236, %22 : vector<1x256xf32>
    %c27 = arith.constant 27 : index
    %238 = memref.load %arg1[%c27] : memref<98xf32, #tpu.memory_space<smem>>
    %239 = vector.broadcast %238 : f32 to vector<1x256xf32>
    %240 = arith.mulf %239, %25 : vector<1x256xf32>
    %c70 = arith.constant 70 : index
    %241 = memref.load %arg1[%c70] : memref<98xf32, #tpu.memory_space<smem>>
    %242 = vector.broadcast %241 : f32 to vector<1x256xf32>
    %243 = arith.mulf %242, %28 : vector<1x256xf32>
    %c71 = arith.constant 71 : index
    %244 = memref.load %arg1[%c71] : memref<98xf32, #tpu.memory_space<smem>>
    %245 = vector.broadcast %244 : f32 to vector<1x256xf32>
    %246 = arith.mulf %245, %31 : vector<1x256xf32>
    %c72 = arith.constant 72 : index
    %247 = memref.load %arg1[%c72] : memref<98xf32, #tpu.memory_space<smem>>
    %248 = vector.broadcast %247 : f32 to vector<1x256xf32>
    %249 = arith.mulf %248, %34 : vector<1x256xf32>
    %c73 = arith.constant 73 : index
    %250 = memref.load %arg1[%c73] : memref<98xf32, #tpu.memory_space<smem>>
    %251 = vector.broadcast %250 : f32 to vector<1x256xf32>
    %252 = arith.mulf %251, %36 : vector<1x256xf32>
    %c74 = arith.constant 74 : index
    %253 = memref.load %arg1[%c74] : memref<98xf32, #tpu.memory_space<smem>>
    %254 = vector.broadcast %253 : f32 to vector<1x256xf32>
    %255 = arith.mulf %254, %39 : vector<1x256xf32>
    %c75 = arith.constant 75 : index
    %256 = memref.load %arg1[%c75] : memref<98xf32, #tpu.memory_space<smem>>
    %257 = vector.broadcast %256 : f32 to vector<1x256xf32>
    %258 = arith.mulf %257, %42 : vector<1x256xf32>
    %c76 = arith.constant 76 : index
    %259 = memref.load %arg1[%c76] : memref<98xf32, #tpu.memory_space<smem>>
    %260 = vector.broadcast %259 : f32 to vector<1x256xf32>
    %261 = arith.mulf %260, %45 : vector<1x256xf32>
    %262 = arith.addf %222, %225 : vector<1x256xf32>
    %263 = arith.addf %228, %231 : vector<1x256xf32>
    %264 = arith.addf %234, %237 : vector<1x256xf32>
    %265 = arith.addf %240, %243 : vector<1x256xf32>
    %266 = arith.addf %246, %249 : vector<1x256xf32>
    %267 = arith.addf %252, %255 : vector<1x256xf32>
    %268 = arith.addf %258, %261 : vector<1x256xf32>
    %269 = arith.addf %262, %263 : vector<1x256xf32>
    %270 = arith.addf %264, %265 : vector<1x256xf32>
    %271 = arith.addf %266, %267 : vector<1x256xf32>
    %272 = arith.addf %269, %270 : vector<1x256xf32>
    %273 = arith.addf %271, %268 : vector<1x256xf32>
    %274 = arith.addf %272, %273 : vector<1x256xf32>
    %275 = vector.extract_strided_slice %5 {offsets = [10, 0], sizes = [1, 256], strides = [1, 1]} : vector<14x256xf32> to vector<1x256xf32>
    %276 = arith.mulf %274, %275 : vector<1x256xf32>
    %c28 = arith.constant 28 : index
    %277 = memref.load %arg1[%c28] : memref<98xf32, #tpu.memory_space<smem>>
    %278 = vector.broadcast %277 : f32 to vector<1x256xf32>
    %279 = arith.mulf %278, %8 : vector<1x256xf32>
    %c29 = arith.constant 29 : index
    %280 = memref.load %arg1[%c29] : memref<98xf32, #tpu.memory_space<smem>>
    %281 = vector.broadcast %280 : f32 to vector<1x256xf32>
    %282 = arith.mulf %281, %11 : vector<1x256xf32>
    %c30 = arith.constant 30 : index
    %283 = memref.load %arg1[%c30] : memref<98xf32, #tpu.memory_space<smem>>
    %284 = vector.broadcast %283 : f32 to vector<1x256xf32>
    %285 = arith.mulf %284, %14 : vector<1x256xf32>
    %c31 = arith.constant 31 : index
    %286 = memref.load %arg1[%c31] : memref<98xf32, #tpu.memory_space<smem>>
    %287 = vector.broadcast %286 : f32 to vector<1x256xf32>
    %288 = arith.mulf %287, %16 : vector<1x256xf32>
    %c32 = arith.constant 32 : index
    %289 = memref.load %arg1[%c32] : memref<98xf32, #tpu.memory_space<smem>>
    %290 = vector.broadcast %289 : f32 to vector<1x256xf32>
    %291 = arith.mulf %290, %19 : vector<1x256xf32>
    %c33 = arith.constant 33 : index
    %292 = memref.load %arg1[%c33] : memref<98xf32, #tpu.memory_space<smem>>
    %293 = vector.broadcast %292 : f32 to vector<1x256xf32>
    %294 = arith.mulf %293, %22 : vector<1x256xf32>
    %c34 = arith.constant 34 : index
    %295 = memref.load %arg1[%c34] : memref<98xf32, #tpu.memory_space<smem>>
    %296 = vector.broadcast %295 : f32 to vector<1x256xf32>
    %297 = arith.mulf %296, %25 : vector<1x256xf32>
    %c77 = arith.constant 77 : index
    %298 = memref.load %arg1[%c77] : memref<98xf32, #tpu.memory_space<smem>>
    %299 = vector.broadcast %298 : f32 to vector<1x256xf32>
    %300 = arith.mulf %299, %28 : vector<1x256xf32>
    %c78 = arith.constant 78 : index
    %301 = memref.load %arg1[%c78] : memref<98xf32, #tpu.memory_space<smem>>
    %302 = vector.broadcast %301 : f32 to vector<1x256xf32>
    %303 = arith.mulf %302, %31 : vector<1x256xf32>
    %c79 = arith.constant 79 : index
    %304 = memref.load %arg1[%c79] : memref<98xf32, #tpu.memory_space<smem>>
    %305 = vector.broadcast %304 : f32 to vector<1x256xf32>
    %306 = arith.mulf %305, %34 : vector<1x256xf32>
    %c80 = arith.constant 80 : index
    %307 = memref.load %arg1[%c80] : memref<98xf32, #tpu.memory_space<smem>>
    %308 = vector.broadcast %307 : f32 to vector<1x256xf32>
    %309 = arith.mulf %308, %36 : vector<1x256xf32>
    %c81 = arith.constant 81 : index
    %310 = memref.load %arg1[%c81] : memref<98xf32, #tpu.memory_space<smem>>
    %311 = vector.broadcast %310 : f32 to vector<1x256xf32>
    %312 = arith.mulf %311, %39 : vector<1x256xf32>
    %c82 = arith.constant 82 : index
    %313 = memref.load %arg1[%c82] : memref<98xf32, #tpu.memory_space<smem>>
    %314 = vector.broadcast %313 : f32 to vector<1x256xf32>
    %315 = arith.mulf %314, %42 : vector<1x256xf32>
    %c83 = arith.constant 83 : index
    %316 = memref.load %arg1[%c83] : memref<98xf32, #tpu.memory_space<smem>>
    %317 = vector.broadcast %316 : f32 to vector<1x256xf32>
    %318 = arith.mulf %317, %45 : vector<1x256xf32>
    %319 = arith.addf %279, %282 : vector<1x256xf32>
    %320 = arith.addf %285, %288 : vector<1x256xf32>
    %321 = arith.addf %291, %294 : vector<1x256xf32>
    %322 = arith.addf %297, %300 : vector<1x256xf32>
    %323 = arith.addf %303, %306 : vector<1x256xf32>
    %324 = arith.addf %309, %312 : vector<1x256xf32>
    %325 = arith.addf %315, %318 : vector<1x256xf32>
    %326 = arith.addf %319, %320 : vector<1x256xf32>
    %327 = arith.addf %321, %322 : vector<1x256xf32>
    %328 = arith.addf %323, %324 : vector<1x256xf32>
    %329 = arith.addf %326, %327 : vector<1x256xf32>
    %330 = arith.addf %328, %325 : vector<1x256xf32>
    %331 = arith.addf %329, %330 : vector<1x256xf32>
    %c240_i32 = arith.constant 240 : i32
    %332 = tpu.dynamic_rotate %331 by %c240_i32 dim 1 : vector<1x256xf32>, i32 -> vector<1x256xf32>
    %333 = vector.extract_strided_slice %5 {offsets = [11, 0], sizes = [1, 256], strides = [1, 1]} : vector<14x256xf32> to vector<1x256xf32>
    %334 = arith.mulf %332, %333 : vector<1x256xf32>
    %c35 = arith.constant 35 : index
    %335 = memref.load %arg1[%c35] : memref<98xf32, #tpu.memory_space<smem>>
    %336 = vector.broadcast %335 : f32 to vector<1x256xf32>
    %337 = arith.mulf %336, %8 : vector<1x256xf32>
    %c36 = arith.constant 36 : index
    %338 = memref.load %arg1[%c36] : memref<98xf32, #tpu.memory_space<smem>>
    %339 = vector.broadcast %338 : f32 to vector<1x256xf32>
    %340 = arith.mulf %339, %11 : vector<1x256xf32>
    %c37 = arith.constant 37 : index
    %341 = memref.load %arg1[%c37] : memref<98xf32, #tpu.memory_space<smem>>
    %342 = vector.broadcast %341 : f32 to vector<1x256xf32>
    %343 = arith.mulf %342, %14 : vector<1x256xf32>
    %c38 = arith.constant 38 : index
    %344 = memref.load %arg1[%c38] : memref<98xf32, #tpu.memory_space<smem>>
    %345 = vector.broadcast %344 : f32 to vector<1x256xf32>
    %346 = arith.mulf %345, %16 : vector<1x256xf32>
    %c39 = arith.constant 39 : index
    %347 = memref.load %arg1[%c39] : memref<98xf32, #tpu.memory_space<smem>>
    %348 = vector.broadcast %347 : f32 to vector<1x256xf32>
    %349 = arith.mulf %348, %19 : vector<1x256xf32>
    %c40 = arith.constant 40 : index
    %350 = memref.load %arg1[%c40] : memref<98xf32, #tpu.memory_space<smem>>
    %351 = vector.broadcast %350 : f32 to vector<1x256xf32>
    %352 = arith.mulf %351, %22 : vector<1x256xf32>
    %c41 = arith.constant 41 : index
    %353 = memref.load %arg1[%c41] : memref<98xf32, #tpu.memory_space<smem>>
    %354 = vector.broadcast %353 : f32 to vector<1x256xf32>
    %355 = arith.mulf %354, %25 : vector<1x256xf32>
    %c84 = arith.constant 84 : index
    %356 = memref.load %arg1[%c84] : memref<98xf32, #tpu.memory_space<smem>>
    %357 = vector.broadcast %356 : f32 to vector<1x256xf32>
    %358 = arith.mulf %357, %28 : vector<1x256xf32>
    %c85 = arith.constant 85 : index
    %359 = memref.load %arg1[%c85] : memref<98xf32, #tpu.memory_space<smem>>
    %360 = vector.broadcast %359 : f32 to vector<1x256xf32>
    %361 = arith.mulf %360, %31 : vector<1x256xf32>
    %c86 = arith.constant 86 : index
    %362 = memref.load %arg1[%c86] : memref<98xf32, #tpu.memory_space<smem>>
    %363 = vector.broadcast %362 : f32 to vector<1x256xf32>
    %364 = arith.mulf %363, %34 : vector<1x256xf32>
    %c87 = arith.constant 87 : index
    %365 = memref.load %arg1[%c87] : memref<98xf32, #tpu.memory_space<smem>>
    %366 = vector.broadcast %365 : f32 to vector<1x256xf32>
    %367 = arith.mulf %366, %36 : vector<1x256xf32>
    %c88 = arith.constant 88 : index
    %368 = memref.load %arg1[%c88] : memref<98xf32, #tpu.memory_space<smem>>
    %369 = vector.broadcast %368 : f32 to vector<1x256xf32>
    %370 = arith.mulf %369, %39 : vector<1x256xf32>
    %c89 = arith.constant 89 : index
    %371 = memref.load %arg1[%c89] : memref<98xf32, #tpu.memory_space<smem>>
    %372 = vector.broadcast %371 : f32 to vector<1x256xf32>
    %373 = arith.mulf %372, %42 : vector<1x256xf32>
    %c90 = arith.constant 90 : index
    %374 = memref.load %arg1[%c90] : memref<98xf32, #tpu.memory_space<smem>>
    %375 = vector.broadcast %374 : f32 to vector<1x256xf32>
    %376 = arith.mulf %375, %45 : vector<1x256xf32>
    %377 = arith.addf %337, %340 : vector<1x256xf32>
    %378 = arith.addf %343, %346 : vector<1x256xf32>
    %379 = arith.addf %349, %352 : vector<1x256xf32>
    %380 = arith.addf %355, %358 : vector<1x256xf32>
    %381 = arith.addf %361, %364 : vector<1x256xf32>
    %382 = arith.addf %367, %370 : vector<1x256xf32>
    %383 = arith.addf %373, %376 : vector<1x256xf32>
    %384 = arith.addf %377, %378 : vector<1x256xf32>
    %385 = arith.addf %379, %380 : vector<1x256xf32>
    %386 = arith.addf %381, %382 : vector<1x256xf32>
    %387 = arith.addf %384, %385 : vector<1x256xf32>
    %388 = arith.addf %386, %383 : vector<1x256xf32>
    %389 = arith.addf %387, %388 : vector<1x256xf32>
    %c224_i32 = arith.constant 224 : i32
    %390 = tpu.dynamic_rotate %389 by %c224_i32 dim 1 : vector<1x256xf32>, i32 -> vector<1x256xf32>
    %391 = vector.extract_strided_slice %5 {offsets = [12, 0], sizes = [1, 256], strides = [1, 1]} : vector<14x256xf32> to vector<1x256xf32>
    %392 = arith.mulf %390, %391 : vector<1x256xf32>
    %c42 = arith.constant 42 : index
    %393 = memref.load %arg1[%c42] : memref<98xf32, #tpu.memory_space<smem>>
    %394 = vector.broadcast %393 : f32 to vector<1x256xf32>
    %395 = arith.mulf %394, %8 : vector<1x256xf32>
    %c43 = arith.constant 43 : index
    %396 = memref.load %arg1[%c43] : memref<98xf32, #tpu.memory_space<smem>>
    %397 = vector.broadcast %396 : f32 to vector<1x256xf32>
    %398 = arith.mulf %397, %11 : vector<1x256xf32>
    %c44 = arith.constant 44 : index
    %399 = memref.load %arg1[%c44] : memref<98xf32, #tpu.memory_space<smem>>
    %400 = vector.broadcast %399 : f32 to vector<1x256xf32>
    %401 = arith.mulf %400, %14 : vector<1x256xf32>
    %c45 = arith.constant 45 : index
    %402 = memref.load %arg1[%c45] : memref<98xf32, #tpu.memory_space<smem>>
    %403 = vector.broadcast %402 : f32 to vector<1x256xf32>
    %404 = arith.mulf %403, %16 : vector<1x256xf32>
    %c46 = arith.constant 46 : index
    %405 = memref.load %arg1[%c46] : memref<98xf32, #tpu.memory_space<smem>>
    %406 = vector.broadcast %405 : f32 to vector<1x256xf32>
    %407 = arith.mulf %406, %19 : vector<1x256xf32>
    %c47 = arith.constant 47 : index
    %408 = memref.load %arg1[%c47] : memref<98xf32, #tpu.memory_space<smem>>
    %409 = vector.broadcast %408 : f32 to vector<1x256xf32>
    %410 = arith.mulf %409, %22 : vector<1x256xf32>
    %c48 = arith.constant 48 : index
    %411 = memref.load %arg1[%c48] : memref<98xf32, #tpu.memory_space<smem>>
    %412 = vector.broadcast %411 : f32 to vector<1x256xf32>
    %413 = arith.mulf %412, %25 : vector<1x256xf32>
    %c91 = arith.constant 91 : index
    %414 = memref.load %arg1[%c91] : memref<98xf32, #tpu.memory_space<smem>>
    %415 = vector.broadcast %414 : f32 to vector<1x256xf32>
    %416 = arith.mulf %415, %28 : vector<1x256xf32>
    %c92 = arith.constant 92 : index
    %417 = memref.load %arg1[%c92] : memref<98xf32, #tpu.memory_space<smem>>
    %418 = vector.broadcast %417 : f32 to vector<1x256xf32>
    %419 = arith.mulf %418, %31 : vector<1x256xf32>
    %c93 = arith.constant 93 : index
    %420 = memref.load %arg1[%c93] : memref<98xf32, #tpu.memory_space<smem>>
    %421 = vector.broadcast %420 : f32 to vector<1x256xf32>
    %422 = arith.mulf %421, %34 : vector<1x256xf32>
    %c94 = arith.constant 94 : index
    %423 = memref.load %arg1[%c94] : memref<98xf32, #tpu.memory_space<smem>>
    %424 = vector.broadcast %423 : f32 to vector<1x256xf32>
    %425 = arith.mulf %424, %36 : vector<1x256xf32>
    %c95 = arith.constant 95 : index
    %426 = memref.load %arg1[%c95] : memref<98xf32, #tpu.memory_space<smem>>
    %427 = vector.broadcast %426 : f32 to vector<1x256xf32>
    %428 = arith.mulf %427, %39 : vector<1x256xf32>
    %c96 = arith.constant 96 : index
    %429 = memref.load %arg1[%c96] : memref<98xf32, #tpu.memory_space<smem>>
    %430 = vector.broadcast %429 : f32 to vector<1x256xf32>
    %431 = arith.mulf %430, %42 : vector<1x256xf32>
    %c97 = arith.constant 97 : index
    %432 = memref.load %arg1[%c97] : memref<98xf32, #tpu.memory_space<smem>>
    %433 = vector.broadcast %432 : f32 to vector<1x256xf32>
    %434 = arith.mulf %433, %45 : vector<1x256xf32>
    %435 = arith.addf %395, %398 : vector<1x256xf32>
    %436 = arith.addf %401, %404 : vector<1x256xf32>
    %437 = arith.addf %407, %410 : vector<1x256xf32>
    %438 = arith.addf %413, %416 : vector<1x256xf32>
    %439 = arith.addf %419, %422 : vector<1x256xf32>
    %440 = arith.addf %425, %428 : vector<1x256xf32>
    %441 = arith.addf %431, %434 : vector<1x256xf32>
    %442 = arith.addf %435, %436 : vector<1x256xf32>
    %443 = arith.addf %437, %438 : vector<1x256xf32>
    %444 = arith.addf %439, %440 : vector<1x256xf32>
    %445 = arith.addf %442, %443 : vector<1x256xf32>
    %446 = arith.addf %444, %441 : vector<1x256xf32>
    %447 = arith.addf %445, %446 : vector<1x256xf32>
    %c208_i32 = arith.constant 208 : i32
    %448 = tpu.dynamic_rotate %447 by %c208_i32 dim 1 : vector<1x256xf32>, i32 -> vector<1x256xf32>
    %449 = vector.extract_strided_slice %5 {offsets = [13, 0], sizes = [1, 256], strides = [1, 1]} : vector<14x256xf32> to vector<1x256xf32>
    %450 = arith.mulf %448, %449 : vector<1x256xf32>
    %451 = arith.addf %103, %161 : vector<1x256xf32>
    %452 = arith.addf %219, %276 : vector<1x256xf32>
    %453 = arith.addf %334, %392 : vector<1x256xf32>
    %454 = arith.addf %451, %452 : vector<1x256xf32>
    %455 = arith.addf %453, %450 : vector<1x256xf32>
    %456 = arith.addf %454, %455 : vector<1x256xf32>
    %457 = arith.negf %456 : vector<1x256xf32>
    %458 = math.exp %457 : vector<1x256xf32>
    %cst_13 = arith.constant 1.000000e+00 : f32
    %459 = vector.broadcast %cst_13 : f32 to vector<1x256xf32>
    %460 = arith.addf %459, %458 : vector<1x256xf32>
    %461 = arith.divf %459, %460 : vector<1x256xf32>
    %462 = vector.shape_cast %461 : vector<1x256xf32> to vector<1x1x256xf32>
    %463 = vector.broadcast %462 : vector<1x1x256xf32> to vector<1x4x256xf32>
    %464 = arith.mulf %0, %463 : vector<1x4x256xf32>
    %c0_14 = arith.constant 0 : index
    %c0_15 = arith.constant 0 : index
    %c0_16 = arith.constant 0 : index
    %465 = vector.load %arg4[%c0_14, %c0_15, %c0_16] : memref<1x4x256xf32, #tpu.memory_space<vmem>>, vector<1x4x256xf32>
    tpu.vector_store %arg4[%c0_14, %c0_15, %c0_16], %464 {strides = array<i32>} : memref<1x4x256xf32, #tpu.memory_space<vmem>>, vector<1x4x256xf32>,
    return
  }
  func.func @transform_0(%arg0: i32) -> i32 {
    %c0_i32 = arith.constant 0 : i32
    %c0_i32_0 = arith.constant 0 : i32
    return %c0_i32 : i32
  }
  func.func @transform_1(%arg0: i32) -> (i32, i32) {
    %c0_i32 = arith.constant 0 : i32
    %c0_i32_0 = arith.constant 0 : i32
    %c0_i32_1 = arith.constant 0 : i32
    return %c0_i32, %c0_i32_0 : i32, i32
  }
  func.func @transform_2(%arg0: i32) -> (i32, i32, i32) {
    %c0_i32 = arith.constant 0 : i32
    %c0_i32_0 = arith.constant 0 : i32
    %c0_i32_1 = arith.constant 0 : i32
    return %arg0, %c0_i32, %c0_i32_0 : i32, i32, i32
  }
  func.func @transform_3(%arg0: i32) -> (i32, i32, i32) {
    %c0_i32 = arith.constant 0 : i32
    %c0_i32_0 = arith.constant 0 : i32
    %c0_i32_1 = arith.constant 0 : i32
    return %arg0, %c0_i32, %c0_i32_0 : i32, i32, i32
  }
}

</mosaic_0001>

<bundles_post_ra>
// kernel: tpu_custom_call.1
= control target key start
LH: loop header
LB: loop body
LE: loop exit
PB: predicated region body
PF: predicated region fallthrough
CT: control target
= control target key end

     0   :  { %s3133_s0 = inlined_call_operand.hbm [shape: f32[98], index: 0, kind: input, shape index: {}]   ;;  %s3134_s1 = inlined_call_operand.hbm [shape: f32[14,256], index: 1, kind: input, shape index: {}]   ;;  %s3135_s2 = inlined_call_operand.hbm [shape: f32[2,4,256], index: 2, kind: input, shape index: {}]   ;;  %s3136_s3 = inlined_call_operand.hbm [shape: f32[2,4,256], index: 3, kind: output, shape index: {}]  }
   0x1   :  { %3278 = sst [smem:[#allocation93_spill]] %s3133_s0 }
   0x2   :  { %3279 = sst [smem:[#allocation94_spill]] %s3134_s1 }
   0x3   :  { %3280 = sst [smem:[#allocation95_spill]] %s3135_s2 }
   0x4   :  { %3281 = sst [smem:[#allocation96_spill]] %s3136_s3 }
   0x5   :  { %8 = vsyncpa [#allocation5], 0 }
   0x6   :  { %9 = vsyncpa [#allocation3], 0 }
   0x7   :  { %10 = vsyncpa [#allocation8], 0 }
   0x8   :  { %12 = vsyncpa [#allocation8 + $0x1], 0 }
   0x9   :  { %13 = vsyncpa [#allocation4], 0 }
   0xa   :  { %15 = vsyncpa [#allocation4 + $0x1], 0  ;;  %s1710_s12 = smov 0   ;;  %s1712_s13 = smov 0  }
   0xb   :  { %s1714_s14 = smov 0   ;;  %s1716_s15 = smov 0  }
   0xc LB: > { %3282 = sst [smem:[#allocation14_spill]] %s1658_s12  ;;  %s1731_s16 = sadd.s32 4294967295, %s1670_s15   ;;  %s1670_s15 = sphi %s1716_s15, %s3618_s15   ;;  %s1666_s14 = sphi %s1714_s14, %s3621_s14   ;;  %s1662_s13 = sphi %s1712_s13, %s3620_s13   ;;  %s1658_s12 = sphi %s1710_s12, %s3619_s12  }
   0xd   : > { %3283 = sst [smem:[#allocation15_spill]] %s1662_s13  ;;  %s1313_s17 = sadd.s32 4294967294, %s1670_s15  }
   0xe   : > { %3284 = sst [smem:[#allocation16_spill]] %s1666_s14  ;;  %p83_p0 = scmp.ne.s32.totalorder %s1662_s13, %s1658_s12 }
   0xf   : > { %3285 = sst [smem:[#allocation17_spill]] %s1670_s15  ;;  %p3137_p1 = scmp.eq.s32.totalorder %s1731_s16, 0 }
  0x10   : > { %3286 = sst [smem:[#allocation18_spill]] %s1731_s16  ;;  %p113_p3 = scmp.eq.s32.totalorder %s1313_s17, 1 }
  0x11   : > { %p1740_p4 = por %p3137_p1, %p83_p0  ;;  %p1314_p5 = scmp.ge.s32.totalorder %s1670_s15, 1 }
  0x12   : > { %p1745_p6 = por %p113_p3, %p83_p0  ;;  %p120_p7 = scmp.lt.s32.totalorder %s1670_s15, 3 }
  0x13   : > { %s3287_s18 = scalar_select %p1740_p4, 1, 0 }
  0x14   : > { %s3288_s19 = scalar_select %p1745_p6, 1, 0 }
  0x15   : > { %p1750_p8 = pnand %p1314_p5, %p120_p7  ;;  %s1672_s21 = smov [#allocation6]  }
  0x16   : > { %3289 = sst [smem:[#allocation19_spill]] %s3288_s19  ;;  %s141_s22 = sshll.u32 %s1672_s21, 4  ;;  %s1757_s22 = int_to_ptr.vmem [resolvable:$true] %s141_s22 }
  0x17   : > { %p1444_p10 = pneg %p1750_p8  ;;  %s1766_s24 = sadd.s32 1, %s1670_s15  }
  0x18   : > { %3292 = sst [smem:[#allocation20_spill]] %s1766_s24  ;;  %s67_s25 = ssub.s32 %s1670_s15, %s1766_s24 }
  0x19   : > { %p1761_p11 = pnand %p1444_p10, %p3137_p1  ;;  %s3293_s0 = sld [smem:[#allocation93_spill]] }
  0x1b   : > { %p1527_p13 = pneg %p1761_p11 }
  0x1f   : > { %s1525_s28 = scalar_lea.hbm %s3293_s0, 16 }
  0x20   : > { %p1526_p12 = scmp.ne.s32.totalorder %s3293_s0, %s1525_s28  ;;  %p1532_p5 = scmp.lt.u32.totalorder %s1525_s28, %s3293_s0 }
  0x22   : > { %p1528_p0 = pnand %p1527_p13, %p1526_p12 }
  0x24   : > { %p1529_p3 = pneg %p1528_p0 }
  0x26   : > { %p1534_p7 = pnand %p1532_p5, %p1529_p3 }
  0x28   : > { %1537 = shalt.err (!%p1534_p7)
}
  0x29   : > { %s1673_s6 = smov [#allocation2]   ;;  %s3294_s1 = sld [smem:[#allocation94_spill]] }
  0x2a   : > { %1447 = dma.hbm_to_smem (!%p1761_p11), %s3293_s0, 16, %s1673_s6, [#allocation5]  }
  0x2f   : > { %s1538_s11 = scalar_lea.hbm %s3294_s1, 512 }
  0x30   : > { %p1539_p10 = scmp.ne.s32.totalorder %s3294_s1, %s1538_s11  ;;  %p1545_p3 = scmp.lt.u32.totalorder %s1538_s11, %s3294_s1 }
  0x32   : > { %p1541_p12 = pnand %p1539_p10, %p1527_p13 }
  0x34   : > { %p1542_p0 = pneg %p1541_p12 }
  0x36   : > { %p1547_p5 = pnand %p1545_p3, %p1542_p0 }
  0x38   : > { %1550 = shalt.err (!%p1547_p5)
}
  0x39   : > { %s1551_s28 = scalar_lea.vmem %s1757_s22, 512  ;;  %p1559_p2 = scmp.lt.s32.totalorder %s1757_s22, %s1757_s22 }
  0x3a   : > { %p1552_p7 = scmp.ne.s32.totalorder %s1757_s22, %s1551_s28  ;;  %p1560_p10 = scmp.lt.s32.totalorder %s1551_s28, %s1551_s28 }
  0x3c   : > { %p1554_p9 = pnand %p1552_p7, %p1527_p13  ;;  %p1561_p12 = por %p1560_p10, %p1559_p2 }
  0x3e   : > { %p1555_p1 = pneg %p1554_p9 }
  0x40   : > { %p1562_p6 = pnand %p1561_p12, %p1555_p1 }
  0x42   : > { %1565 = shalt.err (!%p1562_p6)
}
  0x43   : > { %s1674_s29 = smov 256   ;;  %s1675_s30 = smov 16  }
  0x44   : > { %1450 = dma.hbm_to_vmem [thread:$0]  (!%p1761_p11), %s3294_s1, 512, %s1757_s22, [#allocation3], %s1674_s29, %s1674_s29, %s1675_s30  }
  0x45   : > { %p68_p1 = scmp.eq.s32.totalorder %s67_s25, 0  ;;  %s70_s6 = sadd.s32 1, %s1666_s14 }
  0x46   : > { %p77_p2 = scmp.ne.s32.totalorder %s1666_s14, %s1662_s13  ;;  %p78_p6 = scmp.eq.s32.totalorder %s1670_s15, 0 }
  0x47   : > { %s1822_s7 = scalar_select %p68_p1, %s1666_s14, %s70_s6  }
  0x48   : > { %p79_p9 = por %p78_p6, %p77_p2  ;;  %p3296_p13 = scmp.eq.s32.totalorder %s1731_s16, 1 }
  0x49   : > { %3295 = sst [smem:[#allocation21_spill]] %s1822_s7  ;;  %p1461_p3 = scmp.lt.s32.totalorder %s1670_s15, 2 }
  0x4a   : > { %p1826_p0 = por %p3296_p13, %p77_p2  ;;  %s155_s9 = sand.u32 1, %s1666_s14  }
  0x4b   : > { %s1318_s23 = sshll.u32 %s155_s9, 3  ;;  %s1430_s10 = sshll.u32 %s1670_s15, 7 }
  0x4c   : > { %s3297_s8 = scalar_select %p1826_p0, 1, 0 }
  0x4d   : > { %s3299_s2 = sld [smem:[#allocation95_spill]]  ;;  %s159_s25 = scalar_lea.vmem [#allocation7], %s1318_s23 }
  0x4e   : > { %3298 = sst [smem:[#allocation22_spill]] %s3297_s8  ;;  %s167_s21 = sshll.u32 %s159_s25, 4  ;;  %s1838_s21 = int_to_ptr.vmem [resolvable:$true] %s167_s21 }
  0x4f   : > { %p1840_p11 = pnand %p1461_p3, %p79_p9  ;;  %s156_s27 = scalar_lea.sflag [#allocation8], %s155_s9 }
  0x51   : > { %p1568_p7 = pneg %p1840_p11 }
  0x53   : > { %s1836_s22 = scalar_lea.hbm %s3299_s2, %s1430_s10  ;;  %s1571_s4 = scalar_lea.hbm %s3299_s2, 256 }
  0x54   : > { %s1566_s28 = scalar_lea.hbm %s1836_s22, 128  ;;  %p1572_p1 = scmp.lt.u32.totalorder %s1836_s22, %s3299_s2 }
  0x55   : > { %p1567_p5 = scmp.ne.s32.totalorder %s1836_s22, %s1566_s28  ;;  %p1573_p2 = scmp.lt.u32.totalorder %s1571_s4, %s1566_s28 }
  0x56   : > { %p1575_p9 = scmp.lt.u32.totalorder %s1566_s28, %s1836_s22 }
  0x57   : > { %p1569_p10 = pnand %p1568_p7, %p1567_p5  ;;  %p1574_p6 = por %p1573_p2, %p1572_p1 }
  0x59   : > { %p1570_p12 = pneg %p1569_p10  ;;  %p1576_p13 = por %p1575_p9, %p1574_p6 }
  0x5b   : > { %p1577_p3 = pnand %p1576_p13, %p1570_p12 }
  0x5d   : > { %1580 = shalt.err (!%p1577_p3)
}
  0x5e   : > { %s1581_s9 = scalar_lea.vmem %s1838_s21, 128  ;;  %s1676_s23 = smov [#allocation7]  }
  0x5f   : > { %p1582_p5 = scmp.ne.s32.totalorder %s1838_s21, %s1581_s9  ;;  %s1586_s10 = sshll.u32 %s1676_s23, 4  ;;  %s1587_s10 = int_to_ptr.vmem [resolvable:$false] %s1586_s10 }
  0x60   : > { %s1588_s11 = scalar_lea.vmem %s1587_s10, 256  ;;  %p1589_p4 = scmp.lt.s32.totalorder %s1838_s21, %s1587_s10 }
  0x61   : > { %p1584_p10 = pnand %p1582_p5, %p1568_p7  ;;  %p1590_p1 = scmp.lt.s32.totalorder %s1588_s11, %s1581_s9 }
  0x63   : > { %p1585_p0 = pneg %p1584_p10  ;;  %p1591_p2 = por %p1590_p1, %p1589_p4 }
  0x65   : > { %p1592_p6 = pnand %p1591_p2, %p1585_p0 }
  0x67   : > { %1595 = shalt.err (!%p1592_p6)
}
  0x68   : > { %1454 = dma.hbm_to_vmem [thread:$0]  (!%p1840_p11), %s1836_s22, 128, %s1838_s21, %s156_s27  }
  0x69   : > { %176 = sbr.rel (%p1750_p8) target bundleno = 563 (0x233), region = 32 }
  0x70   : > { %p3301_p7 = scmp.eq.s32.totalorder %s1731_s16, 0 }
  0x72   : > { %1641 = dma.done.wait (%p3301_p7), [#allocation5], 16   ;;  %p3302_p12 = pmov %p3301_p7 }
  0x73   : > { %p3303_p9 = pmov %p3301_p7 }
  0x74   : > { %1643 = vsyncadd (%p3302_p12), [#allocation5], 4294967280 }
  0x75   : > { %1645 = dma.done.wait (%p3303_p9), [#allocation3], 512   ;;  %p3304_p4 = pmov %p3301_p7 }
  0x76   : > { %s1880_s17 = sand.u32 1, %s1662_s13   ;;  %p3307_p8 = scmp.ne.s32.totalorder %s3287_s18, 0 }
  0x77   : > { %1647 = vsyncadd (%p3304_p4), [#allocation3], 4294966784  ;;  %3305 = sst [smem:[#allocation23_spill]] %s1880_s17  ;;  %s3140_s20 = sshll.u32 %s1880_s17, 3 }
  0x78   : > { %s187_s22 = scalar_lea.sflag [#allocation8], %s1880_s17  ;;  %s1886_s25 = scalar_lea.vmem [#allocation7], %s3140_s20 }
  0x79   : > { %3306 = sst [smem:[#allocation24_spill]] %s1886_s25 }
  0x7a   : > { %1649 = dma.done.wait (%p3307_p8), %s187_s22, 128  }
  0x7b   : > { %1651 = vsyncadd (%p3307_p8), %s187_s22, 4294967168 }
  0x7c   : > { %195 = sfence }
  0x7d   : > { %v214_v0 = vld [vmem:[%s1886_s25] sm:$0xff]  ;;  %vm218_vm0 = vcmask 1043456   ;;  %s1677_s18 = smov 127   ;;  %s1678_s21 = smov 3   ;;  %v3203_v32 = vlaneseq }
  0x7e   : > { %v236_v1 = vsel %vm218_vm0, %v214_v0, -inf  ;;  %v219_v2 = vsel %vm218_vm0, %v214_v0, 0.0  ;;  %v216_v3 = vcombine.high %v214_v0, %v214_v0  ;;  %s1679_s26 = smov 2   ;;  %s1680_s27 = smov 1   ;;  %v1969_v33 = vld [vmem:[#allocation6] sm:$0xff]  ;;  %v1971_v34 = vld [vmem:[#allocation6 + $0x8] sm:$0xff] }
  0x7f   : > { %v237_v4 = vrot.slane %v236_v1, 4  ;;  %v220_v5 = vrot.slane %v219_v2, 4  ;;  %s1681_s28 = smov 126   ;;  %s1682_s29 = smov 125   ;;  %v1982_v35 = vand.u32 127, %v3203_v32  ;;  %v302_v36 = vrot.slane %v1969_v33, 4 }
  0x80   : > { %v243_v6 = vsel %vm218_vm0, %v216_v3, -inf  ;;  %v226_v7 = vsel %vm218_vm0, %v216_v3, 0.0  ;;  %s1925_s30 = sld [smem:[#allocation2]]  ;;  %s1927_s4 = sld [smem:[#allocation2 + $0x34]]  ;;  %v3234_v37 = vrot.slane %v1971_v34, 4  ;;  %v3246_v38 = vrot.slane %v1969_v33, 1 }
  0x81   : > { %v238_v8 = vmax.f32 %v236_v1, %v237_v4  ;;  %v221_v9 = vadd.f32 %v220_v5, %v219_v2  ;;  %v244_v10 = vrot.slane %v243_v6, 4  ;;  %v227_v11 = vrot.slane %v226_v7, 4  ;;  %s1929_s5 = sld [smem:[#allocation2 + $0x35]]  ;;  %s1931_s6 = sld [smem:[#allocation2 + $0x7]]  ;;  %3328 = vst [vmem:[#allocation45_spill] sm:$0xff] %v1982_v35 }
  0x82   : > { %s1933_s9 = sld [smem:[#allocation2 + $0x3b]]  ;;  %s1935_s23 = sld [smem:[#allocation2 + $0x3c]]  ;;  %v3241_v39 = vrot.slane %v1971_v34, 1  ;;  %v3244_v48 = vrot.slane %v1969_v33, 2  ;;  %v3245_v52 = vrot.slane %v1971_v34, 2  ;;  %vm299_vm1 = vcmp.lt.s32.totalorder %v1982_v35, 127 }
  0x83   : > { %v239_v12 = vrot.slane %v238_v8, 2  ;;  %v222_v13 = vrot.slane %v221_v9, 2  ;;  %v245_v14 = vmax.f32 %v243_v6, %v244_v10  ;;  %v228_v15 = vadd.f32 %v227_v11, %v226_v7  ;;  %s1937_s10 = sld [smem:[#allocation2 + $0x1]]  ;;  %s1939_s11 = sld [smem:[#allocation2 + $0x43]] }
  0x84   : > { %s1941_s22 = sld [smem:[#allocation2 + $0x8]]  ;;  %s1955_s20 = sld [smem:[#allocation2 + $0xf]]  ;;  %vm260_vm2 = vcmp.lt.s32.totalorder %v1982_v35, 3  ;;  %vm269_vm3 = vcmp.lt.s32.totalorder %v1982_v35, 2  ;;  %vm284_vm4 = vcmp.lt.s32.totalorder %v1982_v35, 1  ;;  %vm312_vm5 = vcmp.lt.s32.totalorder %v1982_v35, 126 }
  0x85   : > { %v240_v16 = vmax.f32 %v238_v8, %v239_v12  ;;  %v223_v17 = vadd.f32 %v222_v13, %v221_v9  ;;  %v246_v18 = vrot.slane %v245_v14, 2  ;;  %v229_v19 = vrot.slane %v228_v15, 2  ;;  %s1957_s0 = sld [smem:[#allocation2 + $0x4]]  ;;  %s1959_s1 = sld [smem:[#allocation2 + $0x11]] }
  0x86   : > { %3308 = sst [smem:[#allocation25_spill]] %s1925_s30  ;;  %s1963_s7 = sld [smem:[#allocation2 + $0x10]]  ;;  %v385_v41 = vstv %s1925_s30  ;;  %v425_v42 = vstv %s1927_s4  ;;  %vm325_vm6 = vcmp.lt.s32.totalorder %v1982_v35, 125 }
  0x87   : > { %v241_v20 = vrot.slane %v240_v16, 1  ;;  %v224_v21 = vrot.slane %v223_v17, 1  ;;  %v247_v22 = vmax.f32 %v245_v14, %v246_v18  ;;  %v230_v23 = vadd.f32 %v229_v19, %v228_v15  ;;  %3309 = sst [smem:[#allocation26_spill]] %s1929_s5  ;;  %s1961_s2 = sld [smem:[#allocation2 + $0xb]] }
  0x88   : > { %3310 = sst [smem:[#allocation27_spill]] %s1931_s6  ;;  %s1967_s13 = sld [smem:[#allocation2 + $0xc]]  ;;  %v429_v43 = vstv %s1929_s5  ;;  %v498_v50 = vstv %s1931_s6  ;;  %v538_v51 = vstv %s1933_s9  ;;  %v542_v55 = vstv %s1935_s23 }
  0x89   : > { %v1893_v24 = vmax.f32 %v240_v16, %v241_v20  ;;  %v225_v25 = vadd.f32 %v224_v21, %v223_v17  ;;  %v248_v26 = vrot.slane %v247_v22, 1  ;;  %v231_v27 = vrot.slane %v230_v23, 1  ;;  %3311 = sst [smem:[#allocation28_spill]] %s1935_s23  ;;  %s1965_s14 = sld [smem:[#allocation2 + $0x5]] }
  0x8a   : > { %3312 = sst [smem:[#allocation29_spill]] %s1937_s10  ;;  %s1973_s24 = sld [smem:[#allocation2 + $0x6]]  ;;  %v389_v53 = vstv %s1937_s10  ;;  %v502_v54 = vstv %s1941_s22  ;;  %v3252_v10 = vstv %s1955_s20  ;;  %v651_v19 = vstv %s1939_s11 }
  0x8b   : > { %360 = vrot.lane.b32.xlu0 %v1893_v24, %s1677_s18  ;;  %v1896_v28 = vmul.f32 0.25, %v225_v25  ;;  %v1898_v29 = vmax.f32 %v247_v22, %v248_v26  ;;  %v232_v30 = vadd.f32 %v231_v27, %v230_v23  ;;  %3313 = sst [smem:[#allocation30_spill]] %s1939_s11  ;;  %s1975_s15 = sld [smem:[#allocation2 + $0x12]]  ;;  %v2013_v44 = vmul.f32 %v1969_v33, %v1893_v24 }
  0x8c   : > { %3314 = sst [smem:[#allocation31_spill]] %s1941_s22  ;;  %s1977_s19 = sld [smem:[#allocation2 + $0xd]]  ;;  %v619_v59 = vstv %s1959_s1 }
  0x8d   : > { %254 = vrot.lane.b32.xlu1 %v1896_v28, %s1678_s21  ;;  %v1901_v31 = vmul.f32 0.25, %v232_v30  ;;  %3318 = sst [smem:[#allocation35_spill]] %s1955_s20  ;;  %s1979_s12 = sld [smem:[#allocation2 + $0x13]]  ;;  %v2002_v40 = vmul.f32 %v1969_v33, %v1896_v28  ;;  %3338 = vst [vmem:[#allocation55_spill] sm:$0xff] %v2013_v44  ;;  %v2028_v49 = vmul.f32 %v1971_v34, %v1898_v29  ;;  %v2057_v60 = vmul.f32 %v425_v42, %v2013_v44 }
  0x8e   : > { %3319 = sst [smem:[#allocation36_spill]] %s1957_s0  ;;  %s1984_s3 = sld [smem:[#allocation2 + $0x31]]  ;;  %v2076_v3 = vmul.f32 %v538_v51, %v2013_v44 }
  0x8f   : > { %362 = vrot.lane.b32.xlu0 %v1898_v29, %s1677_s18  ;;  %3320 = sst [smem:[#allocation37_spill]] %s1961_s2  ;;  %s1986_s8 = sld [smem:[#allocation2 + $0x38]]  ;;  %3335 = vst [vmem:[#allocation52_spill] sm:$0xff] %v2002_v40  ;;  %v2020_v46 = vmul.f32 %v1971_v34, %v1901_v31  ;;  %3342 = vst [vmem:[#allocation59_spill] sm:$0xff] %v2028_v49  ;;  %v2072_v1 = vmul.f32 %v425_v42, %v2028_v49  ;;  %v2085_v6 = vmul.f32 %v538_v51, %v2028_v49 }
  0x90   : > { %3321 = sst [smem:[#allocation38_spill]] %s1963_s7  ;;  %s1990_s25 = sld [smem:[#allocation2 + $0x32]]  ;;  %v2088_v7 = vmul.f32 %v619_v59, %v2002_v40 }
  0x91   : > { %256 = vrot.lane.b32.xlu1 %v1901_v31, %s1678_s21  ;;  %3322 = sst [smem:[#allocation39_spill]] %s1965_s14  ;;  %s1992_s17 = sld [smem:[#allocation2 + $0x14]]  ;;  %3340 = vst [vmem:[#allocation57_spill] sm:$0xff] %v2020_v46  ;;  %v2124_v23 = vmul.f32 %v619_v59, %v2020_v46 }
  0x92   : > { %3323 = sst [smem:[#allocation40_spill]] %s1967_s13  ;;  %s1996_s16 = sld [smem:[#allocation2 + $0x39]] }
  0x93   : > { %265 = vrot.lane.b32.xlu0 %v1896_v28, %s1679_s26  ;;  %3324 = sst [smem:[#allocation41_spill]] %s1973_s24  ;;  %s2023_s4 = sld [smem:[#allocation2 + $0x40]] }
  0x94   : > { %3325 = sst [smem:[#allocation42_spill]] %s1975_s15  ;;  %s2034_s30 = sld [smem:[#allocation2 + $0x41]] }
  0x95   : > { %267 = vrot.lane.b32.xlu1 %v1901_v31, %s1679_s26  ;;  %3326 = sst [smem:[#allocation43_spill]] %s1977_s19  ;;  %s2042_s5 = sld [smem:[#allocation2 + $0x3e]] }
  0x96   : > { %3327 = sst [smem:[#allocation44_spill]] %s1979_s12  ;;  %s1998_s12 = sld [smem:[#allocation2 + $0x3f]] }
  0x97   : > { %280 = vrot.lane.b32.xlu0 %v1896_v28, %s1680_s27  ;;  %3329 = sst [smem:[#allocation46_spill]] %s1984_s3  ;;  %s2052_s9 = sld [smem:[#allocation2 + $0x44]] }
  0x98   : > { %3330 = sst [smem:[#allocation47_spill]] %s1986_s8  ;;  %s2005_s8 = sld [smem:[#allocation2 + $0x33]] }
  0x99   : > { %282 = vrot.lane.b32.xlu1 %v1901_v31, %s1680_s27  ;;  %3331 = sst [smem:[#allocation48_spill]] %s1990_s25  ;;  %s2054_s6 = sld [smem:[#allocation2 + $0x1c]] }
  0x9a   : > { %3332 = sst [smem:[#allocation49_spill]] %s1992_s17  ;;  %s2066_s22 = sld [smem:[#allocation2 + $0x45]] }
  0x9b   : > { %295 = vrot.lane.b32.xlu0 %v1896_v28, %s1677_s18  ;;  %3333 = sst [smem:[#allocation50_spill]] %s1996_s16  ;;  %s2009_s17 = sld [smem:[#allocation2 + $0x3a]] }
  0x9c   : > { %3334 = sst [smem:[#allocation51_spill]] %s1998_s12  ;;  %s2016_s12 = sld [smem:[#allocation2 + $0x36]] }
  0x9d   : > { %297 = vrot.lane.b32.xlu1 %v1901_v31, %s1677_s18  ;;  %s1943_s18 = sld [smem:[#allocation2 + $0xe]]  ;;  %3341 = sst [smem:[#allocation58_spill]] %s2023_s4 }
  0x9e   : > { %3336 = sst [smem:[#allocation53_spill]] %s2005_s8  ;;  %s2068_s10 = sld [smem:[#allocation2 + $0x1f]] }
  0x9f   : > { %308 = vrot.lane.b32.xlu0 %v1896_v28, %s1681_s28  ;;  %3345 = sst [smem:[#allocation62_spill]] %s2054_s6  ;;  %s2078_s1 = sld [smem:[#allocation2 + $0x50]] }
  0xa0   : > { %3346 = sst [smem:[#allocation63_spill]] %s2066_s22  ;;  %s2102_s23 = sld [smem:[#allocation2 + $0x58]] }
  0xa1   : > { %310 = vrot.lane.b32.xlu1 %v1901_v31, %s1681_s28  ;;  %3337 = sst [smem:[#allocation54_spill]] %s2009_s17  ;;  %s2110_s20 = sld [smem:[#allocation2 + $0x57]] }
  0xa2   : > { %3339 = sst [smem:[#allocation56_spill]] %s2016_s12  ;;  %s3354_s2 = sld [smem:[#allocation44_spill]] }
  0xa3   : > { %321 = vrot.lane.b32.xlu0 %v1896_v28, %s1682_s29  ;;  %3315 = sst [smem:[#allocation32_spill]] %s1943_s18  ;;  %v3247_v58 = vstv %s1943_s18  ;;  %s2080_s18 = sld [smem:[#allocation2 + $0x51]] }
  0xa4   : > { %s3356_s7 = sld [smem:[#allocation49_spill]]  ;;  %s2128_s11 = sld [smem:[#allocation2 + $0x26]] }
  0xa5   : > { %323 = vrot.lane.b32.xlu1 %v1901_v31, %s1682_s29  ;;  %s2136_s13 = sld [smem:[#allocation2 + $0x4e]]  ;;  %s2138_s14 = sld [smem:[#allocation2 + $0x4f]]  ;;  %v840_v31 = vstv %s2068_s10  ;;  %v868_v28 = vstv %s2078_s1 }
  0xa6   : > { %3351 = sst [smem:[#allocation68_spill]] %s2102_s23  ;;  %s2118_s23 = sld [smem:[#allocation2 + $0x22]]  ;;  %v2167_v51 = vmul.f32 %v840_v31, %v2002_v40  ;;  %v2194_v32 = vmul.f32 %v868_v28, %v2013_v44 }
  0xa7   : > { %334 = vrot.lane.b32.xlu0 %v1893_v24, %s1678_s21  ;;  %s2146_s19 = sld [smem:[#allocation2 + $0x53]]  ;;  %s2152_s24 = sld [smem:[#allocation2 + $0x24]]  ;;  %v981_v25 = vstv %s2110_s20 }
  0xa8   : > { %s2154_s15 = sld [smem:[#allocation2 + $0x25]]  ;;  %s2160_s10 = sld [smem:[#allocation2 + $0x27]]  ;;  %3358 = vst [vmem:[#allocation70_spill] sm:$0xff] %v2167_v51  ;;  %3367 = vst [vmem:[#allocation71_spill] sm:$0xff] %v2194_v32  ;;  %v2216_v17 = vmul.f32 %v981_v25, %v2013_v44  ;;  %v2241_v30 = vmul.f32 %v981_v25, %v2028_v49 }
  0xa9   : > { %336 = vrot.lane.b32.xlu1 %v1898_v29, %s1678_s21  ;;  %s1945_s21 = sld [smem:[#allocation2 + $0x3]]  ;;  %3347 = sst [smem:[#allocation64_spill]] %s2080_s18 }
  0xaa   : > { %s2162_s16 = sld [smem:[#allocation2 + $0x5e]]  ;;  %s2170_s8 = sld [smem:[#allocation2 + $0x2a]]  ;;  %3371 = vst [vmem:[#allocation74_spill] sm:$0xff] %v2216_v17  ;;  %3376 = vst [vmem:[#allocation78_spill] sm:$0xff] %v2241_v30 }
  0xab   : > { %342 = vrot.lane.b32.xlu0 %v1893_v24, %s1679_s26  ;;  %s2172_s4 = sld [smem:[#allocation2 + $0x5f]]  ;;  %s2179_s12 = sld [smem:[#allocation2 + $0x28]] }
  0xac   : > { %s2186_s0 = sld [smem:[#allocation2 + $0x29]]  ;;  %s2200_s6 = sld [smem:[#allocation2 + $0x54]] }
  0xad   : > { %344 = vrot.lane.b32.xlu1 %v1898_v29, %s1679_s26  ;;  %s1947_s26 = sld [smem:[#allocation2 + $0xa]]  ;;  %s2202_s18 = sld [smem:[#allocation2 + $0x55]] }
  0xae   : > { %s2209_s20 = sld [smem:[#allocation2 + $0x56]]  ;;  %s2226_s1 = sld [smem:[#allocation2 + $0x5a]] }
  0xaf   : > { %350 = vrot.lane.b32.xlu0 %v1893_v24, %s1680_s27  ;;  %v397_v45 = vstv %s1945_s21  ;;  %s2032_s21 = sld [smem:[#allocation2 + $0x3d]]  ;;  %s2234_s3 = sld [smem:[#allocation2 + $0x2e]] }
  0xb0   : > { %v2045_v56 = vmul.f32 %v397_v45, %v2002_v40  ;;  %v2060_v61 = vmul.f32 %v397_v45, %v2020_v46  ;;  %3359 = sst [smem:[#allocation49_spill]] %s2170_s8  ;;  %v2197_v45 = vmul.f32 %v868_v28, %v2028_v49  ;;  %v1094_v42 = vstv %s2162_s16  ;;  %s2252_s16 = sld [smem:[#allocation2 + $0x2f]] }
  0xb1   : > { %352 = vrot.lane.b32.xlu1 %v1898_v29, %s1680_s27  ;;  %s1949_s27 = sld [smem:[#allocation2 + $0x2]]  ;;  %v2255_v22 = vmul.f32 %v1094_v42, %v2013_v44  ;;  %s3406_s8 = sld [smem:[#allocation37_spill]] }
  0xb2   : > { %3369 = vst [vmem:[#allocation72_spill] sm:$0xff] %v2197_v45 }
  0xb3   : > { %368 = vrot.lane.b32.xlu0 %v1893_v24, %s1681_s28  ;;  %v510_v47 = vstv %s1947_s26  ;;  %s2038_s26 = sld [smem:[#allocation2 + $0x37]]  ;;  %3379 = vst [vmem:[#allocation81_spill] sm:$0xff] %v2255_v22 }
  0xb4   : > { %v2048_v57 = vmul.f32 %v510_v47, %v2002_v40  ;;  %v2063_v62 = vmul.f32 %v510_v47, %v2020_v46  ;;  %v953_v47 = vstv %s2128_s11  ;;  %s2218_s11 = sld [smem:[#allocation2 + $0x59]] }
  0xb5   : > { %370 = vrot.lane.b32.xlu1 %v1898_v29, %s1681_s28  ;;  %s1951_s28 = sld [smem:[#allocation2 + $0x42]]  ;;  %3343 = sst [smem:[#allocation60_spill]] %s2032_s21  ;;  %v2224_v16 = vmul.f32 %v953_v47, %v2002_v40  ;;  %v2245_v59 = vmul.f32 %v953_v47, %v2020_v46  ;;  %v2296_v47 = vmul.f32 %v1094_v42, %v2028_v49 }
  0xb6   : > { %s2181_s21 = sld [smem:[#allocation2 + $0x2d]]  ;;  %3375 = sst [smem:[#allocation77_spill]] %s2234_s3 }
  0xb7   : > { %376 = vrot.lane.b32.xlu0 %v1893_v24, %s1682_s29  ;;  %3316 = sst [smem:[#allocation33_spill]] %s1949_s27  ;;  %v393_v0 = vstv %s1949_s27  ;;  %s2100_s27 = sld [smem:[#allocation2 + $0x20]]  ;;  %3373 = vst [vmem:[#allocation75_spill] sm:$0xff] %v2224_v16  ;;  %3377 = vst [vmem:[#allocation79_spill] sm:$0xff] %v2245_v59  ;;  %v3427_v22 = vstv %s3406_s8  ;;  %v3447_v59 = vrot.slane %v1969_v33, 1 }
  0xb8   : > { %3378 = sst [smem:[#allocation80_spill]] %s2252_s16  ;;  %3385 = vst [vmem:[#allocation84_spill] sm:$0xff] %v2296_v47  ;;  %s3391_s3 = sld [smem:[#allocation32_spill]]  ;;  %v3401_v47 = vrot.slane %v1971_v34, 4 }
  0xb9   : > { %378 = vrot.lane.b32.xlu1 %v1898_v29, %s1682_s29  ;;  %s1953_s29 = sld [smem:[#allocation2 + $0x9]]  ;;  %3344 = sst [smem:[#allocation61_spill]] %s2038_s26 }
  0xba   : > { %s2189_s26 = sld [smem:[#allocation2 + $0x2b]]  ;;  %s3403_s16 = sld [smem:[#allocation36_spill]] }
  0xbb   : > { %v647_v63 = vstv %s1951_s28  ;;  %s2090_s28 = sld [smem:[#allocation2 + $0x1d]] }
  0xbc   : > { %v2098_v11 = vmul.f32 %v647_v63, %v2013_v44  ;;  %v2134_v27 = vmul.f32 %v647_v63, %v2028_v49  ;;  %v2207_v63 = vmul.f32 %v840_v31, %v2020_v46  ;;  %v1066_v28 = vstv %s2181_s21  ;;  %s3409_s21 = sld [smem:[#allocation40_spill]] }
  0xbd   : > { %3350 = sst [smem:[#allocation67_spill]] %s2100_s27  ;;  %s2116_s27 = sld [smem:[#allocation2 + $0x21]]  ;;  %v2270_v14 = vmul.f32 %v1066_v28, %v2002_v40 }
  0xbe   : > { %3370 = vst [vmem:[#allocation73_spill] sm:$0xff] %v2207_v63 }
  0xbf   : > { %3317 = sst [smem:[#allocation34_spill]] %s1953_s29  ;;  %v506_v2 = vstv %s1953_s29  ;;  %s2092_s29 = sld [smem:[#allocation2 + $0x1e]]  ;;  %3382 = vst [vmem:[#allocation82_spill] sm:$0xff] %v2270_v14 }
  0xc1   : > { %3348 = sst [smem:[#allocation65_spill]] %s2090_s28  ;;  %s2228_s28 = sld [smem:[#allocation2 + $0x2c]] }
  0xc2   : > { %s3360_s17 = sld [smem:[#allocation65_spill]] }
  0xc3   : > { %3361 = sst [smem:[#allocation65_spill]] %s2172_s4  ;;  %s2262_s4 = sld [smem:[#allocation2 + $0x30]] }
  0xc5   : > { %3349 = sst [smem:[#allocation66_spill]] %s2092_s29  ;;  %s2108_s29 = sld [smem:[#allocation2 + $0x23]] }
  0xc6   : > { %s3362_s25 = sld [smem:[#allocation66_spill]] }
  0xc7   : > { %3366 = sst [smem:[#allocation66_spill]] %s2189_s26  ;;  %s3408_s26 = sld [smem:[#allocation39_spill]] }
  0xc8   : > { %3374 = sst [smem:[#allocation76_spill]] %s2228_s28  ;;  %s3399_s28 = sld [smem:[#allocation38_spill]] }
  0xc9   : > { %3381 = sst [smem:[#allocation26_spill]] %s2262_s4  ;;  %s3398_s4 = sld [smem:[#allocation35_spill]] }
  0xcb   : > { %3352 = sst [smem:[#allocation69_spill]] %s2108_s29  ;;  %s2126_s29 = sld [smem:[#allocation2 + $0x4d]] }
  0xce   : > { %v3448_v16 = vstv %s3399_s28 }
  0xcf   : > { %v3446_v30 = vstv %s3398_s4  ;;  %s3451_s4 = sld [smem:[#allocation48_spill]] }
  0xd1   : > { %3355 = sst [smem:[#allocation44_spill]] %s2126_s29  ;;  %s2144_s29 = sld [smem:[#allocation2 + $0x52]] }
  0xd2   : > { %s3368_s22 = sld [smem:[#allocation44_spill]] }
  0xd3   : > { %3372 = sst [smem:[#allocation44_spill]] %s2218_s11  ;;  %s3417_s11 = sld [smem:[#allocation42_spill]] }
  0xd9   : > { %v3449_v63 = vstv %s3417_s11 }
  0xfd   : > { %v361_v26 = vpop.permute.xlu0 %360 }
  0xff   : > { %v255_v21 = vpop.permute.xlu1 %254 }
 0x101   : > { %v363_v25 = vpop.permute.xlu0 %362 }
 0x102   : > { %v364_v12 = vsel %vm299_vm1, %v361_v26, %v363_v25  ;;  %v365_v29 = vsel %vm299_vm1, %v363_v25, %v361_v26 }
 0x103   : > { %v2274_v24 = vmul.f32 %v364_v12, %v302_v36  ;;  %v2278_v5 = vmul.f32 %v365_v29, %v3234_v37  ;;  %v257_v20 = vpop.permute.xlu1 %256 }
 0x104   : > { %v261_v26 = vsel %vm260_vm2, %v255_v21, %v257_v20  ;;  %v262_v25 = vsel %vm260_vm2, %v257_v20, %v255_v21 }
 0x105   : > { %3384 = vst [vmem:[#allocation83_spill] sm:$0xff] %v2278_v5  ;;  %v266_v15 = vpop.permute.xlu0 %265  ;;  %v430_v12 = vmul.f32 %v429_v43, %v2274_v24  ;;  %v431_v29 = vmul.f32 %v429_v43, %v2278_v5  ;;  %v2299_v4 = vmul.f32 %v262_v25, %v1969_v33  ;;  %v543_v20 = vmul.f32 %v542_v55, %v2274_v24 }
 0x106   : > { %v544_v21 = vmul.f32 %v542_v55, %v2278_v5  ;;  %v2309_v31 = vmul.f32 %v261_v26, %v1971_v34  ;;  %v2312_v25 = vmul.f32 %v1066_v28, %v2020_v46  ;;  %v2343_v37 = vmul.f32 %v651_v19, %v2278_v5 }
 0x107   : > { %v268_v43 = vpop.permute.xlu1 %267  ;;  %v458_v42 = vrot.slane %v430_v12, 5  ;;  %v459_v9 = vrot.slane %v431_v29, 5  ;;  %v571_v18 = vrot.slane %v543_v20, 5  ;;  %v2330_v29 = vmul.f32 %v651_v19, %v2274_v24 }
 0x108   : > { %3387 = vst [vmem:[#allocation85_spill] sm:$0xff] %v2309_v31  ;;  %3389 = vst [vmem:[#allocation86_spill] sm:$0xff] %v2312_v25  ;;  %v270_v13 = vsel %vm269_vm3, %v266_v15, %v268_v43  ;;  %v271_v55 = vsel %vm269_vm3, %v268_v43, %v266_v15  ;;  %v386_v43 = vmul.f32 %v385_v41, %v2299_v4  ;;  %v3405_v25 = vrot.slane %v2048_v57, 3 }
 0x109   : > { %v2321_v26 = vmul.f32 %v3246_v38, %v271_v55  ;;  %v281_v12 = vpop.permute.xlu0 %280  ;;  %v2325_v28 = vadd.f32 %v458_v42, %v2057_v60  ;;  %v2335_v20 = vmul.f32 %v3241_v39, %v270_v13  ;;  %v572_v55 = vrot.slane %v544_v21, 5 }
 0x10a   : > { %v387_v42 = vmul.f32 %v385_v41, %v2309_v31  ;;  %v2349_v15 = vadd.f32 %v459_v9, %v2072_v1  ;;  %v499_v13 = vmul.f32 %v498_v50, %v2299_v4  ;;  %v2355_v39 = vadd.f32 %v571_v18, %v2076_v3 }
 0x10b   : > { %3392 = vst [vmem:[#allocation87_spill] sm:$0xff] %v2335_v20  ;;  %v283_v60 = vpop.permute.xlu1 %282  ;;  %v500_v41 = vmul.f32 %v498_v50, %v2309_v31  ;;  %v608_v1 = vmul.f32 %v3247_v58, %v2299_v4 }
 0x10c   : > { %v285_v19 = vsel %vm284_vm4, %v281_v12, %v283_v60  ;;  %v286_v21 = vsel %vm284_vm4, %v283_v60, %v281_v12  ;;  %v390_v12 = vmul.f32 %v389_v53, %v2321_v26  ;;  %v391_v60 = vmul.f32 %v389_v53, %v2335_v20 }
 0x10d   : > { %v2369_v3 = vmul.f32 %v3244_v48, %v286_v21  ;;  %v2373_v9 = vmul.f32 %v3245_v52, %v285_v19  ;;  %v296_v18 = vpop.permute.xlu0 %295  ;;  %v503_v21 = vmul.f32 %v502_v54, %v2321_v26  ;;  %v504_v48 = vmul.f32 %v502_v54, %v2335_v20 }
 0x10e   : > { %v2390_v19 = vadd.f32 %v572_v55, %v2085_v6  ;;  %v612_v55 = vmul.f32 %v3252_v10, %v2321_v26  ;;  %v440_v40 = vadd.f32 %v390_v12, %v386_v43  ;;  %v3404_v6 = vrot.slane %v2060_v61, 3 }
 0x10f   : > { %3397 = vst [vmem:[#allocation88_spill] sm:$0xff] %v2373_v9  ;;  %v298_v52 = vpop.permute.xlu1 %297  ;;  %v394_v38 = vmul.f32 %v393_v0, %v2369_v3  ;;  %v395_v58 = vmul.f32 %v393_v0, %v2373_v9  ;;  %v507_v50 = vmul.f32 %v506_v2, %v2369_v3  ;;  %v508_v53 = vmul.f32 %v506_v2, %v2373_v9 }
 0x110   : > { %v300_v8 = vsel %vm299_vm1, %v296_v18, %v298_v52  ;;  %v301_v54 = vsel %vm299_vm1, %v298_v52, %v296_v18  ;;  %v3400_v2 = vrot.slane %v2045_v56, 3  ;;  %v441_v18 = vadd.f32 %v391_v60, %v387_v42 }
 0x111   : > { %v2414_v0 = vmul.f32 %v302_v36, %v300_v8  ;;  %v309_v46 = vpop.permute.xlu0 %308  ;;  %v2421_v52 = vmul.f32 %v3401_v47, %v301_v54  ;;  %v449_v10 = vadd.f32 %v3404_v6, %v395_v58  ;;  %v553_v36 = vadd.f32 %v503_v21, %v499_v13 }
 0x112   : > { %v448_v49 = vadd.f32 %v3400_v2, %v394_v38  ;;  %v561_v43 = vadd.f32 %v3405_v25, %v507_v50  ;;  %v554_v56 = vadd.f32 %v504_v48, %v500_v41  ;;  %v3407_v38 = vrot.slane %v2063_v62, 3 }
 0x113   : > { %3402 = vst [vmem:[#allocation89_spill] sm:$0xff] %v2421_v52  ;;  %v311_v8 = vpop.permute.xlu1 %310  ;;  %v3410_v61 = vstv %s3399_s28  ;;  %v662_v25 = vadd.f32 %v612_v55, %v608_v1  ;;  %v3411_v48 = vrot.slane %v1969_v33, 5  ;;  %v3412_v13 = vrot.slane %v1971_v34, 5  ;;  %s3453_s28 = sld [smem:[#allocation50_spill]] }
 0x114   : > { %v562_v12 = vadd.f32 %v3407_v38, %v508_v53  ;;  %v313_v42 = vsel %vm312_vm5, %v309_v46, %v311_v8  ;;  %v314_v58 = vsel %vm312_vm5, %v311_v8, %v309_v46  ;;  %v616_v57 = vmul.f32 %v3410_v61, %v2369_v3 }
 0x115   : > { %v2439_v62 = vmul.f32 %v3411_v48, %v313_v42  ;;  %v2443_v41 = vmul.f32 %v3412_v13, %v314_v58  ;;  %v322_v50 = vpop.permute.xlu0 %321  ;;  %v3414_v60 = vstv %s3403_s16  ;;  %v2448_v53 = vadd.f32 %v448_v49, %v440_v40  ;;  %s3429_s16 = sld [smem:[#allocation41_spill]] }
 0x116   : > { %v402_v21 = vmul.f32 %v3414_v60, %v2414_v0  ;;  %v3415_v46 = vmov %v3414_v60  ;;  %v2453_v6 = vadd.f32 %v449_v10, %v441_v18  ;;  %v3416_v1 = vstv %s3406_s8  ;;  %s3432_s8 = sld [smem:[#allocation46_spill]] }
 0x117   : > { %3413 = vst [vmem:[#allocation90_spill] sm:$0xff] %v2443_v41  ;;  %v403_v54 = vmul.f32 %v3415_v46, %v2421_v52  ;;  %v515_v55 = vmul.f32 %v3416_v1, %v2414_v0  ;;  %v680_v2 = vrot.slane %v2330_v29, 5  ;;  %v324_v8 = vpop.permute.xlu1 %323  ;;  %v3418_v38 = vstv %s3408_s26  ;;  %s3431_s26 = sld [smem:[#allocation43_spill]] }
 0x118   : > { %v406_v42 = vmul.f32 %v3418_v38, %v2439_v62  ;;  %v3419_v58 = vmov %v3418_v38  ;;  %v3420_v49 = vstv %s3409_s21  ;;  %v326_v48 = vsel %vm325_vm6, %v322_v50, %v324_v8  ;;  %s3433_s21 = sld [smem:[#allocation47_spill]] }
 0x119   : > { %v407_v40 = vmul.f32 %v3419_v58, %v2443_v41  ;;  %v519_v61 = vmul.f32 %v3420_v49, %v2439_v62  ;;  %v3421_v10 = vmov %v3420_v49  ;;  %v327_v29 = vsel %vm325_vm6, %v324_v8, %v322_v50 }
 0x11a   : > { %v520_v18 = vmul.f32 %v3421_v10, %v2443_v41  ;;  %v3422_v13 = vstv %s3354_s2  ;;  %v3423_v46 = vrot.slane %v2088_v7, 3  ;;  %v3424_v38 = vrot.slane %v1969_v33, 6  ;;  %v335_v10 = vpop.permute.xlu0 %334 }
 0x11b   : > { %v628_v60 = vmul.f32 %v3422_v13, %v2439_v62  ;;  %v3425_v49 = vrot.slane %v1971_v34, 6  ;;  %v2488_v44 = vadd.f32 %v561_v43, %v553_v36  ;;  %v516_v50 = vmul.f32 %v3427_v22, %v2421_v52  ;;  %v337_v36 = vpop.permute.xlu1 %336 }
 0x11c   : > { %v670_v1 = vadd.f32 %v3423_v46, %v616_v57  ;;  %v2482_v58 = vmul.f32 %v3424_v38, %v326_v48  ;;  %v2493_v8 = vadd.f32 %v562_v12, %v554_v56  ;;  %v3428_v13 = vstv %s3417_s11  ;;  %s3456_s11 = sld [smem:[#allocation53_spill]] }
 0x11d   : > { %v2486_v47 = vmul.f32 %v3425_v49, %v327_v29  ;;  %v624_v7 = vmul.f32 %v3428_v13, %v2414_v0  ;;  %v2499_v57 = vadd.f32 %v680_v2, %v2098_v11  ;;  %v3430_v48 = vstv %s3391_s3  ;;  %s3434_s3 = sld [smem:[#allocation51_spill]] }
 0x11e   : > { %v609_v29 = vmul.f32 %v3430_v48, %v2309_v31  ;;  %v450_v43 = vadd.f32 %v406_v42, %v402_v21  ;;  %v451_v46 = vadd.f32 %v407_v40, %v403_v54  ;;  %v563_v22 = vadd.f32 %v519_v61, %v515_v55  ;;  %v343_v55 = vpop.permute.xlu0 %342 }
 0x11f   : > { %3426 = vst [vmem:[#allocation91_spill] sm:$0xff] %v2486_v47  ;;  %v2504_v56 = vadd.f32 %v520_v18, %v516_v50  ;;  %v338_v12 = vsel %vm260_vm2, %v335_v10, %v337_v36  ;;  %v339_v11 = vsel %vm260_vm2, %v337_v36, %v335_v10  ;;  %v2510_v2 = vadd.f32 %v628_v60, %v624_v7  ;;  %v345_v7 = vpop.permute.xlu1 %344 }
 0x120   : > { %v2512_v38 = vadd.f32 %v670_v1, %v662_v25  ;;  %v2515_v21 = vmul.f32 %v339_v11, %v1969_v33  ;;  %v2518_v54 = vmul.f32 %v338_v12, %v1971_v34  ;;  %v3436_v42 = vstv %s3429_s16  ;;  %s3472_s16 = sld [smem:[#allocation56_spill]] }
 0x121   : > { %v410_v40 = vmul.f32 %v3436_v42, %v2482_v58  ;;  %v3437_v61 = vmov %v3436_v42  ;;  %v3438_v60 = vstv %s3431_s26  ;;  %v3440_v10 = vstv %s3356_s7  ;;  %s3474_s26 = sld [smem:[#allocation60_spill]] }
 0x122   : > { %3435 = vst [vmem:[#allocation92_spill] sm:$0xff] %v2518_v54  ;;  %v411_v18 = vmul.f32 %v3437_v61, %v2486_v47  ;;  %v523_v49 = vmul.f32 %v3438_v60, %v2482_v58  ;;  %v3439_v25 = vmov %v3438_v60  ;;  %v632_v50 = vmul.f32 %v3440_v10, %v2482_v58  ;;  %v351_v17 = vpop.permute.xlu0 %350 }
 0x123   : > { %v524_v1 = vmul.f32 %v3439_v25, %v2486_v47  ;;  %v3441_v48 = vstv %s3432_s8  ;;  %v3443_v42 = vstv %s3433_s21  ;;  %v346_v10 = vsel %vm269_vm3, %v343_v55, %v345_v7  ;;  %s3475_s8 = sld [smem:[#allocation61_spill]]  ;;  %s3478_s21 = sld [smem:[#allocation63_spill]] }
 0x124   : > { %v414_v36 = vmul.f32 %v3441_v48, %v2515_v21  ;;  %v3442_v12 = vmov %v3441_v48  ;;  %v527_v61 = vmul.f32 %v3443_v42, %v2515_v21  ;;  %v3444_v60 = vmov %v3443_v42 }
 0x125   : > { %v415_v11 = vmul.f32 %v3442_v12, %v2518_v54  ;;  %v528_v25 = vmul.f32 %v3444_v60, %v2518_v54  ;;  %v347_v13 = vsel %vm269_vm3, %v345_v7, %v343_v55  ;;  %v3445_v48 = vstv %s3434_s3 }
 0x126   : > { %v636_v14 = vmul.f32 %v3445_v48, %v2515_v21  ;;  %v613_v12 = vmul.f32 %v3446_v30, %v2335_v20  ;;  %v2560_v42 = vmul.f32 %v347_v13, %v3447_v59  ;;  %v452_v60 = vadd.f32 %v414_v36, %v410_v40  ;;  %v353_v40 = vpop.permute.xlu1 %352 }
 0x127   : > { %v2565_v45 = vmul.f32 %v3448_v16, %v2373_v9  ;;  %v2570_v31 = vmul.f32 %v3449_v63, %v2421_v52  ;;  %v3450_v55 = vrot.slane %v1971_v34, 1  ;;  %v453_v30 = vadd.f32 %v415_v11, %v411_v18 }
 0x128   : > { %v565_v48 = vadd.f32 %v527_v61, %v523_v49  ;;  %v3452_v59 = vstv %s3354_s2  ;;  %v566_v16 = vadd.f32 %v528_v25, %v524_v1  ;;  %v3454_v36 = vstv %s3356_s7  ;;  %s3457_s2 = sld [smem:[#allocation54_spill]]  ;;  %s3463_s7 = sld [smem:[#allocation58_spill]] }
 0x129   : > { %v2574_v7 = vmul.f32 %v346_v10, %v3450_v55  ;;  %v2579_v13 = vmul.f32 %v3452_v59, %v2443_v41  ;;  %v2584_v5 = vmul.f32 %v3454_v36, %v2486_v47  ;;  %v3455_v63 = vstv %s3434_s3  ;;  %v369_v36 = vpop.permute.xlu0 %368  ;;  %s2695_s3 = sld [smem:[#allocation2 + $0x5b]] }
 0x12a   : > { %v2589_v52 = vmul.f32 %v3455_v63, %v2518_v54  ;;  %v354_v49 = vsel %vm284_vm4, %v351_v17, %v353_v40  ;;  %v355_v11 = vsel %vm284_vm4, %v353_v40, %v351_v17  ;;  %v674_v1 = vadd.f32 %v636_v14, %v632_v50 }
 0x12b   : > { %v2596_v61 = vadd.f32 %v613_v12, %v609_v29  ;;  %v3458_v25 = vrot.slane %v1969_v33, 2  ;;  %v3459_v55 = vrot.slane %v1971_v34, 2  ;;  %v3460_v63 = vstv %s3451_s4  ;;  %s2734_s4 = sld [smem:[#allocation2 + $0x5d]] }
 0x12c   : > { %v418_v18 = vmul.f32 %v3460_v63, %v2560_v42  ;;  %v468_v47 = vadd.f32 %v452_v60, %v450_v43  ;;  %v3461_v17 = vmov %v3460_v63  ;;  %v469_v29 = vadd.f32 %v453_v30, %v451_v46 }
 0x12d   : > { %v2600_v10 = vmul.f32 %v355_v11, %v3458_v25  ;;  %v2604_v59 = vmul.f32 %v354_v49, %v3459_v55  ;;  %v419_v14 = vmul.f32 %v3461_v17, %v2574_v7  ;;  %v3462_v50 = vstv %s3453_s28  ;;  %v371_v11 = vpop.permute.xlu1 %370  ;;  %v377_v41 = vpop.permute.xlu0 %376  ;;  %s3501_s28 = sld [smem:[#allocation62_spill]] }
 0x12e   : > { %v531_v12 = vmul.f32 %v3462_v50, %v2560_v42  ;;  %v581_v40 = vadd.f32 %v565_v48, %v563_v22  ;;  %v3464_v25 = vstv %s3456_s11  ;;  %v3466_v54 = vstv %s3457_s2  ;;  %s3502_s11 = sld [smem:[#allocation67_spill]]  ;;  %s1684_s2 = smov 32  }
 0x12f   : > { %v422_v49 = vmul.f32 %v3464_v25, %v2600_v10  ;;  %v3465_v55 = vmov %v3464_v25  ;;  %v535_v63 = vmul.f32 %v3466_v54, %v2600_v10  ;;  %v3467_v43 = vmov %v3466_v54 }
 0x130   : > { %v423_v9 = vmul.f32 %v3465_v55, %v2604_v59  ;;  %v536_v60 = vmul.f32 %v3467_v43, %v2604_v59  ;;  %v372_v46 = vsel %vm312_vm5, %v369_v36, %v371_v11  ;;  %v373_v30 = vsel %vm312_vm5, %v371_v11, %v369_v36 }
 0x131   : > { %v3468_v22 = vmov %v3462_v50  ;;  %v3469_v17 = vstv %s2034_s30  ;;  %v3470_v25 = vrot.slane %v1969_v33, 5  ;;  %v3471_v54 = vrot.slane %v1971_v34, 5 }
 0x132   : > { %v532_v48 = vmul.f32 %v3468_v22, %v2574_v7  ;;  %v644_v50 = vmul.f32 %v3469_v17, %v2600_v10  ;;  %v454_v20 = vadd.f32 %v422_v49, %v418_v18  ;;  %v3473_v32 = vstv %s3463_s7 }
 0x133   : > { %v2639_v55 = vmul.f32 %v372_v46, %v3470_v25  ;;  %v2643_v43 = vmul.f32 %v373_v30, %v3471_v54  ;;  %v640_v36 = vmul.f32 %v3473_v32, %v2560_v42  ;;  %v478_v11 = vadd.f32 %v468_v47, %v2448_v53  ;;  %v379_v46 = vpop.permute.xlu1 %378 }
 0x134   : > { %v455_v22 = vadd.f32 %v423_v9, %v419_v14  ;;  %v479_v17 = vadd.f32 %v469_v29, %v2453_v6  ;;  %v567_v51 = vadd.f32 %v535_v63, %v531_v12  ;;  %v591_v25 = vadd.f32 %v581_v40, %v2488_v44 }
 0x135   : > { %v568_v30 = vadd.f32 %v536_v60, %v532_v48  ;;  %v582_v18 = vadd.f32 %v566_v16, %v2504_v56  ;;  %v676_v49 = vadd.f32 %v644_v50, %v640_v36  ;;  %v380_v32 = vsel %vm325_vm6, %v377_v41, %v379_v46 }
 0x136   : > { %v381_v9 = vsel %vm325_vm6, %v379_v46, %v377_v41  ;;  %v3476_v47 = vstv %s3472_s16  ;;  %v690_v44 = vadd.f32 %v674_v1, %v2510_v2  ;;  %v3477_v6 = vrot.slane %v1969_v33, 6  ;;  %s2983_s16 = sld [smem:[#allocation2 + $0x4b]] }
 0x137   : > { %v434_v53 = vmul.f32 %v3476_v47, %v2639_v55  ;;  %v3479_v56 = vrot.slane %v1971_v34, 6  ;;  %v3480_v29 = vrot.slane %v2325_v28, 3  ;;  %v3481_v41 = vmov %v3476_v47 }
 0x138   : > { %v2662_v14 = vmul.f32 %v380_v32, %v3477_v6  ;;  %v435_v40 = vmul.f32 %v3481_v41, %v2643_v43  ;;  %v3482_v63 = vrot.slane %v2349_v15, 3  ;;  %v3483_v2 = vstv %s3474_s26  ;;  %s2985_s26 = sld [smem:[#allocation2 + $0x4c]] }
 0x139   : > { %v2666_v16 = vmul.f32 %v381_v9, %v3479_v56  ;;  %v476_v12 = vadd.f32 %v3480_v29, %v454_v20  ;;  %v547_v33 = vmul.f32 %v3483_v2, %v2639_v55  ;;  %v3484_v1 = vrot.slane %v2355_v39, 3 }
 0x13a   : > { %v477_v60 = vadd.f32 %v3482_v63, %v455_v22  ;;  %v3485_v34 = vmov %v3483_v2  ;;  %v3486_v54 = vstv %s3475_s8  ;;  %v3488_v15 = vstv %s2042_s5  ;;  %s1683_s5 = smov 48   ;;  %s1688_s8 = smov 80  }
 0x13b   : > { %v589_v48 = vadd.f32 %v3484_v1, %v567_v51  ;;  %v548_v50 = vmul.f32 %v3485_v34, %v2643_v43  ;;  %v438_v28 = vmul.f32 %v3486_v54, %v2662_v14  ;;  %v3487_v20 = vmov %v3486_v54 }
 0x13c   : > { %v439_v36 = vmul.f32 %v3487_v20, %v2666_v16  ;;  %v551_v22 = vmul.f32 %v3488_v15, %v2662_v14  ;;  %v3489_v46 = vmov %v3488_v15  ;;  %v3490_v39 = vrot.slane %v2390_v19, 3 }
 0x13d   : > { %v552_v32 = vmul.f32 %v3489_v46, %v2666_v16  ;;  %v3491_v9 = vstv %s2052_s9  ;;  %v3492_v6 = vstv %s3478_s21  ;;  %v3493_v29 = vstv %s2034_s30  ;;  %s2719_s30 = sld [smem:[#allocation2 + $0x5c]]  ;;  %s3500_s9 = sld [smem:[#allocation64_spill]] }
 0x13e   : > { %v590_v51 = vadd.f32 %v3490_v39, %v568_v30  ;;  %v656_v47 = vmul.f32 %v3491_v9, %v2639_v55  ;;  %v660_v56 = vmul.f32 %v3492_v6, %v2662_v14  ;;  %v645_v41 = vmul.f32 %v3493_v29, %v2604_v59  ;;  %s1370_s21 = sld [smem:[#allocation2 + $0x18]] }
 0x13f   : > { %v464_v63 = vadd.f32 %v438_v28, %v434_v53  ;;  %v465_v2 = vadd.f32 %v439_v36, %v435_v40  ;;  %v577_v1 = vadd.f32 %v551_v22, %v547_v33  ;;  %v578_v34 = vadd.f32 %v552_v32, %v548_v50 }
 0x140   : > { %v686_v54 = vadd.f32 %v660_v56, %v656_v47  ;;  %v3494_v20 = vstv %s3463_s7  ;;  %v3495_v19 = vmov %v3491_v9  ;;  %v3496_v46 = vmov %v3492_v6  ;;  %s1685_s7 = smov 16  }
 0x141   : > { %v641_v15 = vmul.f32 %v3494_v20, %v2574_v7  ;;  %v657_v30 = vmul.f32 %v3495_v19, %v2643_v43  ;;  %v661_v39 = vmul.f32 %v3496_v46, %v2666_v16  ;;  %v480_v9 = vadd.f32 %v476_v12, %v464_v63 }
 0x142   : > { %v481_v35 = vadd.f32 %v477_v60, %v465_v2  ;;  %v593_v6 = vadd.f32 %v589_v48, %v577_v1  ;;  %v675_v29 = vadd.f32 %v2589_v52, %v2584_v5  ;;  %v594_v53 = vadd.f32 %v590_v51, %v578_v34 }
 0x143   : > { %v3497_v40 = vrot.slane %v2124_v23, 3  ;;  %v677_v50 = vadd.f32 %v645_v41, %v641_v15  ;;  %v3498_v28 = vrot.slane %v2343_v37, 5  ;;  %v482_v22 = vadd.f32 %v480_v9, %v478_v11 }
 0x144   : > { %v483_v12 = vadd.f32 %v481_v35, %v479_v17  ;;  %v3499_v60 = vrot.slane %v2499_v57, 3  ;;  %v673_v5 = vadd.f32 %v2579_v13, %v2570_v31  ;;  %v592_v52 = vadd.f32 %v582_v18, %v2493_v8 }
 0x145   : > { %v671_v33 = vadd.f32 %v3497_v40, %v2565_v45  ;;  %v685_v36 = vadd.f32 %v3498_v28, %v2134_v27  ;;  %v700_v23 = vadd.f32 %v690_v44, %v2512_v38  ;;  %v687_v45 = vadd.f32 %v661_v39, %v657_v30  ;;  %484 = vrot.lane.b32.xlu0 %v482_v22, %s1683_s5  ;;  %v3515_v22 = vld [vmem:[#allocation70_spill] sm:$0xff] }
 0x146   : > { %v698_v48 = vadd.f32 %v3499_v60, %v676_v49  ;;  %486 = vrot.lane.b32.xlu1 %v483_v12, %s1683_s5  ;;  %v595_v35 = vadd.f32 %v593_v6, %v591_v25  ;;  %v691_v31 = vadd.f32 %v675_v29, %v673_v5  ;;  %v1082_v57 = vstv %s2695_s3  ;;  %s1374_s3 = sld [smem:[#allocation2 + $0x46]]  ;;  %s1372_s5 = sld [smem:[#allocation2 + $0x1a]] }
 0x147   : > { %v695_v37 = vrot.slane %v685_v36, 3  ;;  %v596_v8 = vadd.f32 %v594_v53, %v592_v52  ;;  %v689_v38 = vadd.f32 %v671_v33, %v2596_v61  ;;  %v3503_v11 = vstv %s3360_s17  ;;  %v3517_v52 = vld [vmem:[#allocation71_spill] sm:$0xff]  ;;  %s2793_s17 = sld [smem:[#allocation2 + $0x60]] }
 0x148   : > { %v702_v27 = vadd.f32 %v698_v48, %v686_v54  ;;  %v833_v17 = vmul.f32 %v3503_v11, %v2321_v26  ;;  %v3504_v18 = vstv %s3362_s25  ;;  %v3505_v49 = vstv %s2116_s27  ;;  %s1687_s27 = smov 96  }
 0x149   : > { %v699_v13 = vadd.f32 %v695_v37, %v677_v50  ;;  %v837_v25 = vmul.f32 %v3504_v18, %v2369_v3  ;;  %v849_v44 = vmul.f32 %v3505_v49, %v2439_v62  ;;  %v3506_v32 = vstv %s2118_s23  ;;  %597 = vrot.lane.b32.xlu0 %v595_v35, %s1684_s2 }
 0x14a   : > { %v853_v51 = vmul.f32 %v3506_v32, %v2482_v58  ;;  %v3507_v47 = vstv %s3368_s22  ;;  %v3508_v41 = vstv %s2138_s14  ;;  %v3509_v2 = vstv %s3500_s9  ;;  %599 = vrot.lane.b32.xlu1 %v596_v8, %s1684_s2  ;;  %s3578_s22 = sld [smem:[#allocation77_spill]]  ;;  %s3604_s2 = sld [smem:[#allocation18_spill]] }
 0x14b   : > { %v857_v61 = vmul.f32 %v3507_v47, %v2515_v21  ;;  %v703_v56 = vadd.f32 %v699_v13, %v687_v45  ;;  %v865_v63 = vmul.f32 %v3508_v41, %v2600_v10  ;;  %v873_v1 = vmul.f32 %v3509_v2, %v2274_v24  ;;  %v3522_v13 = vld [vmem:[#allocation92_spill] sm:$0xff]  ;;  %v3528_v41 = vld [vmem:[#allocation89_spill] sm:$0xff] }
 0x14c   : > { %v3510_v34 = vstv %s2146_s19  ;;  %v701_v20 = vadd.f32 %v691_v31, %v689_v38  ;;  %v3511_v15 = vstv %s3501_s28  ;;  %v3512_v30 = vstv %s3502_s11  ;;  %v3520_v31 = vld [vmem:[#allocation90_spill] sm:$0xff]  ;;  %s1371_s11 = sld [smem:[#allocation2 + $0x19]] }
 0x14d   : > { %v881_v54 = vmul.f32 %v3510_v34, %v2662_v14  ;;  %v829_v19 = vmul.f32 %v3511_v15, %v2299_v4  ;;  %v845_v46 = vmul.f32 %v3512_v30, %v2414_v0  ;;  %v1086_v39 = vstv %s2719_s30  ;;  %s1369_s30 = sld [smem:[#allocation2 + $0x17]] }
 0x14e   : > { %v3513_v9 = vstv %s2136_s13  ;;  %v3514_v29 = vstv %s2144_s29  ;;  %v895_v40 = vadd.f32 %v857_v61, %v853_v51  ;;  %v901_v33 = vrot.slane %v873_v1, 5 }
 0x14f   : > { %v861_v6 = vmul.f32 %v3513_v9, %v2560_v42  ;;  %v877_v53 = vmul.f32 %v3514_v29, %v2639_v55  ;;  %v704_v50 = vadd.f32 %v702_v27, %v700_v23  ;;  %v705_v28 = vadd.f32 %v703_v56, %v701_v20  ;;  %v3518_v23 = vld [vmem:[#allocation87_spill] sm:$0xff] }
 0x150   : > { %v883_v36 = vadd.f32 %v833_v17, %v829_v19  ;;  %v3516_v12 = vrot.slane %v3515_v22, 3  ;;  %v893_v48 = vadd.f32 %v849_v44, %v845_v46  ;;  %v905_v45 = vadd.f32 %v901_v33, %v3517_v52  ;;  %v3524_v44 = vld [vmem:[#allocation88_spill] sm:$0xff] }
 0x151   : > { %v897_v5 = vadd.f32 %v865_v63, %v861_v6  ;;  %v907_v37 = vadd.f32 %v881_v54, %v877_v53  ;;  %706 = vrot.lane.b32.xlu0 %v704_v50, %s1685_s7  ;;  %708 = vrot.lane.b32.xlu1 %v705_v28, %s1685_s7  ;;  %v3519_v35 = vmov %v3503_v11  ;;  %v3521_v8 = vmov %v3505_v49  ;;  %v3531_v54 = vld [vmem:[#allocation83_spill] sm:$0xff]  ;;  %v3534_v6 = vld [vmem:[#allocation85_spill] sm:$0xff]  ;;  %v3539_v52 = vld [vmem:[#allocation73_spill] sm:$0xff]  ;;  %s3605_s7 = sld [smem:[#allocation23_spill]] }
 0x152   : > { %v891_v60 = vadd.f32 %v3516_v12, %v837_v25  ;;  %v834_v27 = vmul.f32 %v3519_v35, %v3518_v23  ;;  %v850_v38 = vmul.f32 %v3521_v8, %v3520_v31  ;;  %v3523_v11 = vmov %v3507_v47  ;;  %v3526_v47 = vld [vmem:[#allocation91_spill] sm:$0xff] }
 0x153   : > { %v858_v17 = vmul.f32 %v3523_v11, %v3522_v13  ;;  %v1090_v18 = vstv %s2734_s4  ;;  %v911_v25 = vadd.f32 %v895_v40, %v893_v48  ;;  %v915_v49 = vrot.slane %v905_v45, 3  ;;  %v3541_v11 = vld [vmem:[#allocation72_spill] sm:$0xff]  ;;  %s3014_s4 = sld [smem:[#allocation2 + $0x15]] }
 0x154   : > { %v3525_v32 = vstv %s3362_s25  ;;  %v3527_v61 = vstv %s2118_s23  ;;  %v3529_v63 = vmov %v3512_v30  ;;  %v3530_v1 = vstv %s2138_s14  ;;  %s3538_s14 = sld [smem:[#allocation68_spill]]  ;;  %s1686_s25 = smov 112  }
 0x155   : > { %v838_v51 = vmul.f32 %v3525_v32, %v3524_v44  ;;  %v854_v56 = vmul.f32 %v3527_v61, %v3526_v47  ;;  %v846_v2 = vmul.f32 %v3529_v63, %v3528_v41  ;;  %v866_v34 = vmul.f32 %v3530_v1, %v2604_v59  ;;  %s2859_s23 = sld [smem:[#allocation2 + $0x61]] }
 0x156   : > { %v3532_v20 = vstv %s3500_s9  ;;  %v3533_v19 = vstv %s2146_s19  ;;  %v909_v46 = vadd.f32 %v891_v60, %v883_v36  ;;  %v919_v9 = vadd.f32 %v915_v49, %v897_v5  ;;  %s3546_s19 = sld [smem:[#allocation44_spill]]  ;;  %s1373_s9 = sld [smem:[#allocation2 + $0x1b]] }
 0x157   : > { %v874_v15 = vmul.f32 %v3532_v20, %v3531_v54  ;;  %v882_v30 = vmul.f32 %v3533_v19, %v2666_v16  ;;  %v3535_v29 = vstv %s3501_s28  ;;  %v896_v40 = vadd.f32 %v858_v17, %v854_v56  ;;  %s1368_s28 = sld [smem:[#allocation2 + $0x16]] }
 0x158   : > { %v830_v53 = vmul.f32 %v3535_v29, %v3534_v6  ;;  %v3536_v33 = vstv %s2136_s13  ;;  %v3537_v28 = vstv %s2144_s29  ;;  %v894_v12 = vadd.f32 %v850_v38, %v846_v2  ;;  %s3543_s13 = sld [smem:[#allocation69_spill]] }
 0x159   : > { %v862_v50 = vmul.f32 %v3536_v33, %v2574_v7  ;;  %v878_v22 = vmul.f32 %v3537_v28, %v2643_v43  ;;  %v902_v48 = vrot.slane %v874_v15, 5  ;;  %v921_v36 = vadd.f32 %v911_v25, %v909_v46  ;;  %s2959_s29 = sld [smem:[#allocation2 + $0x4a]] }
 0x15a   : > { %v923_v60 = vadd.f32 %v919_v9, %v907_v37  ;;  %v884_v5 = vadd.f32 %v834_v27, %v830_v53  ;;  %v3540_v45 = vrot.slane %v3539_v52, 3  ;;  %v912_v32 = vadd.f32 %v896_v40, %v894_v12 }
 0x15b   : > { %v898_v8 = vadd.f32 %v866_v34, %v862_v50  ;;  %v906_v17 = vadd.f32 %v902_v48, %v3541_v11  ;;  %v908_v49 = vadd.f32 %v882_v30, %v878_v22  ;;  %v3542_v38 = vstv %s2152_s24 }
 0x15c   : > { %v892_v35 = vadd.f32 %v3540_v45, %v838_v51  ;;  %v925_v61 = vadd.f32 %v923_v60, %v921_v36  ;;  %v946_v56 = vmul.f32 %v3542_v38, %v2321_v26  ;;  %v3544_v37 = vstv %s2179_s12 }
 0x15d   : > { %v962_v27 = vmul.f32 %v3544_v37, %v2439_v62  ;;  %v3545_v25 = vstv %s2200_s6  ;;  %v916_v63 = vrot.slane %v906_v17, 3  ;;  %v3547_v2 = vstv %s2154_s15 }
 0x15e   : > { %v970_v51 = vmul.f32 %v3545_v25, %v2515_v21  ;;  %v950_v1 = vmul.f32 %v3547_v2, %v2369_v3  ;;  %v3548_v34 = vstv %s2186_s0  ;;  %v3549_v15 = vstv %s3538_s14  ;;  %927 = vrot.lane.b32.xlu0 %v925_v61, %s1686_s25 }
 0x15f   : > { %v966_v20 = vmul.f32 %v3548_v34, %v2482_v58  ;;  %v986_v19 = vmul.f32 %v3549_v15, %v2274_v24  ;;  %v3550_v30 = vstv %s2160_s10  ;;  %v3551_v9 = vstv %s2209_s20  ;;  %s2975_s20 = sld [smem:[#allocation2 + $0x48]] }
 0x160   : > { %v958_v46 = vmul.f32 %v3550_v30, %v2414_v0  ;;  %v978_v29 = vmul.f32 %v3551_v9, %v2600_v10  ;;  %v3552_v53 = vstv %s2226_s1  ;;  %v1102_v33 = vstv %s2793_s17  ;;  %s3606_s17 = sld [smem:[#allocation24_spill]] }
 0x161   : > { %v994_v40 = vmul.f32 %v3552_v53, %v2662_v14  ;;  %v910_v50 = vadd.f32 %v892_v35, %v884_v5  ;;  %v920_v28 = vadd.f32 %v916_v63, %v898_v8  ;;  %v3553_v22 = vstv %s3543_s13  ;;  %v3556_v8 = vld [vmem:[#allocation75_spill] sm:$0xff] }
 0x162   : > { %v942_v12 = vmul.f32 %v3553_v22, %v2299_v4  ;;  %v1008_v48 = vadd.f32 %v970_v51, %v966_v20  ;;  %v3554_v36 = vstv %s2202_s18  ;;  %v3555_v52 = vstv %s3546_s19  ;;  %v3558_v51 = vld [vmem:[#allocation74_spill] sm:$0xff] }
 0x163   : > { %v974_v60 = vmul.f32 %v3554_v36, %v2560_v42  ;;  %v990_v45 = vmul.f32 %v3555_v52, %v2639_v55  ;;  %v1006_v11 = vadd.f32 %v962_v27, %v958_v46  ;;  %v1014_v17 = vrot.slane %v986_v19, 5 }
 0x164   : > { %v922_v61 = vadd.f32 %v912_v32, %v910_v50  ;;  %v924_v5 = vadd.f32 %v920_v28, %v908_v49  ;;  %v996_v35 = vadd.f32 %v946_v56, %v942_v12  ;;  %v3557_v38 = vrot.slane %v3556_v8, 3 }
 0x165   : > { %v1010_v25 = vadd.f32 %v978_v29, %v974_v60  ;;  %v1018_v63 = vadd.f32 %v1014_v17, %v3558_v51  ;;  %v1020_v2 = vadd.f32 %v994_v40, %v990_v45  ;;  %v1024_v27 = vadd.f32 %v1008_v48, %v1006_v11  ;;  %v3573_v51 = vld [vmem:[#allocation79_spill] sm:$0xff] }
 0x166   : > { %v1004_v37 = vadd.f32 %v3557_v38, %v950_v1  ;;  %v926_v34 = vadd.f32 %v924_v5, %v922_v61  ;;  %v3559_v32 = vstv %s2154_s15  ;;  %v3560_v49 = vstv %s2179_s12  ;;  %s3570_s12 = sld [smem:[#allocation80_spill]]  ;;  %s3572_s15 = sld [smem:[#allocation26_spill]] }
 0x167   : > { %v951_v20 = vmul.f32 %v3559_v32, %v3524_v44  ;;  %v963_v56 = vmul.f32 %v3560_v49, %v3520_v31  ;;  %v3561_v1 = vstv %s2200_s6  ;;  %v1028_v19 = vrot.slane %v1018_v63, 3  ;;  %s3577_s6 = sld [smem:[#allocation66_spill]] }
 0x168   : > { %v971_v15 = vmul.f32 %v3561_v1, %v3522_v13  ;;  %v3562_v30 = vstv %s2186_s0  ;;  %v979_v29 = vmul.f32 %v3551_v9, %v2604_v59  ;;  %v3563_v53 = vstv %s3538_s14  ;;  %929 = vrot.lane.b32.xlu1 %v926_v34, %s1686_s25  ;;  %s3568_s0 = sld [smem:[#allocation76_spill]]  ;;  %v3576_v1 = vld [vmem:[#allocation78_spill] sm:$0xff]  ;;  %s3608_s14 = sld [smem:[#allocation22_spill]] }
 0x169   : > { %v967_v46 = vmul.f32 %v3562_v30, %v3526_v47  ;;  %v987_v40 = vmul.f32 %v3563_v53, %v3531_v54  ;;  %v1022_v50 = vadd.f32 %v1004_v37, %v996_v35  ;;  %v3564_v28 = vstv %s2152_s24  ;;  %s3575_s24 = sld [smem:[#allocation65_spill]] }
 0x16a   : > { %v947_v22 = vmul.f32 %v3564_v28, %v3518_v23  ;;  %v3565_v12 = vstv %s2160_s10  ;;  %v3566_v36 = vstv %s2226_s1  ;;  %v1032_v52 = vadd.f32 %v1028_v19, %v1010_v25  ;;  %s2967_s10 = sld [smem:[#allocation2 + $0x49]]  ;;  %s2973_s1 = sld [smem:[#allocation2 + $0x47]] }
 0x16b   : > { %v959_v48 = vmul.f32 %v3565_v12, %v3528_v41  ;;  %v995_v60 = vmul.f32 %v3566_v36, %v2666_v16  ;;  %v3567_v45 = vstv %s2202_s18  ;;  %v1009_v17 = vadd.f32 %v971_v15, %v967_v46  ;;  %s3582_s18 = sld [smem:[#allocation49_spill]] }
 0x16c   : > { %v975_v11 = vmul.f32 %v3567_v45, %v2574_v7  ;;  %v1015_v61 = vrot.slane %v987_v40, 5  ;;  %v1034_v5 = vadd.f32 %v1024_v27, %v1022_v50  ;;  %v3569_v35 = vstv %s3543_s13  ;;  %s1431_s13 = sshll.u32 %s3604_s2, 7 }
 0x16d   : > { %v943_v8 = vmul.f32 %v3569_v35, %v3534_v6  ;;  %v3571_v38 = vstv %s3546_s19  ;;  %v3574_v63 = vrot.slane %v3573_v51, 3  ;;  %v1036_v25 = vadd.f32 %v1032_v52, %v1020_v2  ;;  %s3609_s19 = sshll.u32 %s3605_s7, 3 }
 0x16e   : > { %v991_v37 = vmul.f32 %v3571_v38, %v2643_v43  ;;  %v1007_v32 = vadd.f32 %v963_v56, %v959_v48  ;;  %v1011_v49 = vadd.f32 %v979_v29, %v975_v11  ;;  %v1019_v15 = vadd.f32 %v1015_v61, %v3576_v1  ;;  %s213_s25 = scalar_lea.vmem [#allocation9], %s3609_s19  ;;  %p3612_p11 = scmp.ne.s32.totalorder %s3608_s14, 0 }
 0x16f   : > { %v1005_v34 = vadd.f32 %v3574_v63, %v951_v20  ;;  %v997_v19 = vadd.f32 %v947_v22, %v943_v8  ;;  %v1083_v30 = vmul.f32 %v1082_v57, %v2515_v21  ;;  %v1106_v46 = vstv %s2859_s23  ;;  %s1219_s23 = sshll.u32 %s213_s25, 4  ;;  %s3091_s23 = int_to_ptr.vmem [resolvable:$true] %s1219_s23 }
 0x170   : > { %v1021_v27 = vadd.f32 %v995_v60, %v991_v37  ;;  %v1038_v9 = vadd.f32 %v1036_v25, %v1034_v5  ;;  %v1025_v53 = vadd.f32 %v1009_v17, %v1007_v32  ;;  %v1029_v40 = vrot.slane %v1019_v15, 3  ;;  %v3587_v25 = vld [vmem:[#allocation82_spill] sm:$0xff] }
 0x171   : > { %v3579_v20 = vstv %s3568_s0  ;;  %v3580_v2 = vstv %s3570_s12  ;;  %v3581_v29 = vstv %s3572_s15  ;;  %v1091_v22 = vmul.f32 %v1090_v18, %v2600_v10 }
 0x172   : > { %v1063_v50 = vmul.f32 %v3579_v20, %v2369_v3  ;;  %v1075_v56 = vmul.f32 %v3580_v2, %v2439_v62  ;;  %v1079_v28 = vmul.f32 %v3581_v29, %v2482_v58  ;;  %v3583_v12 = vstv %s3575_s24  ;;  %1040 = vrot.lane.b32.xlu0 %v1038_v9, %s1687_s27 }
 0x173   : > { %v1099_v48 = vmul.f32 %v3583_v12, %v2274_v24  ;;  %v1023_v36 = vadd.f32 %v1005_v34, %v997_v19  ;;  %v1033_v60 = vadd.f32 %v1029_v40, %v1011_v49  ;;  %v3584_v52 = vstv %s3577_s6  ;;  %v3589_v19 = vld [vmem:[#allocation81_spill] sm:$0xff]  ;;  %v3590_v40 = vld [vmem:[#allocation86_spill] sm:$0xff] }
 0x174   : > { %v1059_v45 = vmul.f32 %v3584_v52, %v2321_v26  ;;  %v3585_v11 = vstv %s3578_s22  ;;  %v1087_v61 = vmul.f32 %v1086_v39, %v2560_v42  ;;  %v1107_v5 = vmul.f32 %v1106_v46, %v2662_v14 }
 0x175   : > { %v1071_v17 = vmul.f32 %v3585_v11, %v2414_v0  ;;  %v1121_v35 = vadd.f32 %v1083_v30, %v1079_v28  ;;  %v1127_v8 = vrot.slane %v1099_v48, 5  ;;  %v1035_v38 = vadd.f32 %v1025_v53, %v1023_v36 }
 0x176   : > { %v1037_v37 = vadd.f32 %v1033_v60, %v1021_v27  ;;  %v3586_v51 = vstv %s3582_s18  ;;  %v1103_v34 = vmul.f32 %v1102_v33, %v2639_v55  ;;  %v3588_v32 = vrot.slane %v3587_v25, 3 }
 0x177   : > { %v1055_v63 = vmul.f32 %v3586_v51, %v2299_v4  ;;  %v1119_v1 = vadd.f32 %v1075_v56, %v1071_v17  ;;  %v1123_v15 = vadd.f32 %v1091_v22, %v1087_v61  ;;  %v1131_v30 = vadd.f32 %v1127_v8, %v3589_v19 }
 0x178   : > { %v1117_v49 = vadd.f32 %v3588_v32, %v1063_v50  ;;  %v1039_v9 = vadd.f32 %v1037_v37, %v1035_v38  ;;  %v1084_v53 = vmul.f32 %v1082_v57, %v3522_v13  ;;  %v1114_v20 = vrot.slane %v3590_v40, 3 }
 0x179   : > { %v1109_v27 = vadd.f32 %v1059_v45, %v1055_v63  ;;  %v1133_v2 = vadd.f32 %v1107_v5, %v1103_v34  ;;  %v1137_v29 = vadd.f32 %v1121_v35, %v1119_v1  ;;  %v1141_v28 = vrot.slane %v1131_v30, 3  ;;  %v3598_v1 = vld [vmem:[#allocation84_spill] sm:$0xff] }
 0x17a   : > { %v3591_v50 = vstv %s3568_s0  ;;  %1042 = vrot.lane.b32.xlu1 %v1039_v9, %s1687_s27  ;;  %v3592_v56 = vstv %s3570_s12  ;;  %v3593_v48 = vstv %s3572_s15  ;;  %v1092_v60 = vmul.f32 %v1090_v18, %v2604_v59  ;;  %s3610_s15 = sld [smem:[#allocation96_spill]]  ;;  %s1689_s27 = smov [#allocation9]  }
 0x17b   : > { %v1064_v12 = vmul.f32 %v3591_v50, %v3524_v44  ;;  %v1076_v22 = vmul.f32 %v3592_v56, %v3520_v31  ;;  %v1080_v36 = vmul.f32 %v3593_v48, %v3526_v47  ;;  %v3594_v57 = vstv %s3575_s24 }
 0x17c   : > { %v1100_v52 = vmul.f32 %v3594_v57, %v3531_v54  ;;  %v1135_v45 = vadd.f32 %v1117_v49, %v1109_v27  ;;  %v1145_v11 = vadd.f32 %v1141_v28, %v1123_v15  ;;  %v3595_v17 = vstv %s3577_s6  ;;  %v3599_v57 = vld [vmem:[#allocation55_spill] sm:$0xff] }
 0x17d   : > { %v1060_v61 = vmul.f32 %v3595_v17, %v3518_v23  ;;  %v3596_v5 = vstv %s3578_s22  ;;  %v1088_v18 = vmul.f32 %v1086_v39, %v2574_v7  ;;  %v1108_v8 = vmul.f32 %v1106_v46, %v2666_v16  ;;  %s1205_s22 = scalar_lea.sflag [#allocation4], %s3605_s7 }
 0x17e   : > { %v1072_v35 = vmul.f32 %v3596_v5, %v3528_v41  ;;  %v1122_v38 = vadd.f32 %v1084_v53, %v1080_v36  ;;  %v1128_v37 = vrot.slane %v1100_v52, 5  ;;  %v1147_v51 = vadd.f32 %v1137_v29, %v1135_v45  ;;  %v3600_v45 = vld [vmem:[#allocation59_spill] sm:$0xff] }
 0x17f   : > { %v1149_v63 = vadd.f32 %v1145_v11, %v1133_v2  ;;  %v3597_v34 = vstv %s3582_s18  ;;  %v1104_v32 = vmul.f32 %v1102_v33, %v2643_v43  ;;  %v1118_v39 = vadd.f32 %v1114_v20, %v1064_v12  ;;  %s1596_s18 = scalar_lea.vmem %s3091_s23, 128 }
 0x180   : > { %v1056_v25 = vmul.f32 %v3597_v34, %v3534_v6  ;;  %v1120_v46 = vadd.f32 %v1076_v22, %v1072_v35  ;;  %v1124_v49 = vadd.f32 %v1092_v60, %v1088_v18  ;;  %v1132_v15 = vadd.f32 %v1128_v37, %v3598_v1  ;;  %s3611_s24 = smov %s3610_s15  ;;  %s3089_s6 = scalar_lea.hbm %s3610_s15, %s1431_s13 }
 0x181   : > { %v1151_v19 = vadd.f32 %v1149_v63, %v1147_v51  ;;  %v1134_v9 = vadd.f32 %v1108_v8, %v1104_v32  ;;  %v766_v2 = vstv %s2959_s29  ;;  %v762_v29 = vstv %s2967_s10  ;;  %p1597_p0 = scmp.ne.s32.totalorder %s3091_s23, %s1596_s18  ;;  %s1600_s29 = sshll.u32 %s1689_s27, 4  ;;  %s1601_s29 = int_to_ptr.vmem [resolvable:$false] %s1600_s29 }
 0x182   : > { %v1110_v30 = vadd.f32 %v1060_v61, %v1056_v25  ;;  %v1138_v27 = vadd.f32 %v1122_v38, %v1120_v46  ;;  %v1142_v33 = vrot.slane %v1132_v15, 3  ;;  %v754_v50 = vstv %s2973_s1  ;;  %s1602_s10 = scalar_lea.vmem %s1601_s29, 256  ;;  %p1603_p5 = scmp.lt.s32.totalorder %s3091_s23, %s1601_s29 }
 0x183   : > { %1153 = vrot.lane.b32.xlu0 %v1151_v19, %s1688_s8  ;;  %v758_v12 = vstv %s2975_s20  ;;  %v767_v56 = vmul.f32 %v766_v2, %v2274_v24  ;;  %v768_v22 = vmul.f32 %v766_v2, %v3531_v54  ;;  %v770_v48 = vstv %s2983_s16  ;;  %v3601_v19 = vld [vmem:[#allocation52_spill] sm:$0xff]  ;;  %p1598_p13 = pnand %p1597_p0, %p3612_p11  ;;  %p1604_p10 = scmp.lt.s32.totalorder %s1602_s10, %s1596_s18 }
 0x184   : > { %v1136_v53 = vadd.f32 %v1118_v39, %v1110_v30  ;;  %v1146_v40 = vadd.f32 %v1142_v33, %v1124_v49  ;;  %v774_v36 = vstv %s2985_s26  ;;  %v763_v52 = vmul.f32 %v762_v29, %v3599_v57 }
 0x185   : > { %v764_v11 = vmul.f32 %v762_v29, %v3600_v45  ;;  %v775_v17 = vmul.f32 %v774_v36, %v2662_v14  ;;  %v759_v61 = vmul.f32 %v758_v12, %v2600_v10  ;;  %v760_v5 = vmul.f32 %v758_v12, %v2604_v59  ;;  %p1599_p3 = pneg %p1598_p13  ;;  %p1605_p1 = por %p1604_p10, %p1603_p5 }
 0x186   : > { %v1148_v20 = vadd.f32 %v1138_v27, %v1136_v53  ;;  %v1150_v28 = vadd.f32 %v1146_v40, %v1134_v9  ;;  %v771_v35 = vmul.f32 %v770_v48, %v2639_v55  ;;  %v776_v18 = vmul.f32 %v774_v36, %v2666_v16  ;;  %v3602_v27 = vld [vmem:[#allocation57_spill] sm:$0xff] }
 0x187   : > { %v755_v24 = vmul.f32 %v754_v50, %v2560_v42  ;;  %v772_v54 = vmul.f32 %v770_v48, %v2643_v43  ;;  %v756_v8 = vmul.f32 %v754_v50, %v2574_v7  ;;  %v795_v38 = vrot.slane %v767_v56, 5  ;;  %p1606_p2 = pnand %p1605_p1, %p1599_p3 }
 0x188   : > { %v1152_v60 = vadd.f32 %v1150_v28, %v1148_v20  ;;  %v796_v37 = vrot.slane %v768_v22, 5  ;;  %v801_v51 = vadd.f32 %v775_v17, %v771_v35  ;;  %v734_v1 = vstv %s1370_s21 }
 0x189   : > { %v802_v63 = vadd.f32 %v776_v18, %v772_v54  ;;  %v791_v14 = vadd.f32 %v759_v61, %v755_v24  ;;  %v792_v34 = vadd.f32 %v760_v5, %v756_v8  ;;  %v799_v10 = vadd.f32 %v795_v38, %v763_v52  ;;  %v3037_v54 = vld [vmem:[#allocation6 + $0x10] sm:$0x3f]  ;;  %v3603_v8 = vld [vmem:[#allocation45_spill] sm:$0xff] }
 0x18a   : > { %1155 = vrot.lane.b32.xlu1 %v1152_v60, %s1688_s8  ;;  %v800_v25 = vadd.f32 %v796_v37, %v764_v11  ;;  %v750_v15 = vstv %s1374_s3  ;;  %v735_v30 = vmul.f32 %v734_v1, %v3601_v19  ;;  %v730_v9 = vstv %s1369_s30 }
 0x18b   : > { %v809_v59 = vrot.slane %v799_v10, 3  ;;  %v736_v33 = vmul.f32 %v734_v1, %v3602_v27  ;;  %v742_v53 = vstv %s1372_s5  ;;  %v746_v40 = vstv %s1373_s9 }
 0x18c   : > { %v810_v32 = vrot.slane %v800_v25, 3  ;;  %v751_v2 = vmul.f32 %v750_v15, %v2515_v21  ;;  %v722_v20 = vstv %s3014_s4  ;;  %v726_v28 = vstv %s1368_s28 }
 0x18d   : > { %v813_v55 = vadd.f32 %v809_v59, %v791_v14  ;;  %v738_v50 = vstv %s1371_s11  ;;  %v752_v12 = vmul.f32 %v750_v15, %v3522_v13  ;;  %v731_v22 = vmul.f32 %v730_v9, %v2369_v3 }
 0x18e   : > { %v814_v39 = vadd.f32 %v810_v32, %v792_v34  ;;  %v743_v48 = vmul.f32 %v742_v53, %v2439_v62  ;;  %v747_v36 = vmul.f32 %v746_v40, %v2482_v58  ;;  %v781_v60 = vrot.slane %v735_v30, 3 }
 0x18f   : > { %v3006_v16 = vadd.f32 %v813_v55, %v801_v51  ;;  %v732_v57 = vmul.f32 %v730_v9, %v3524_v44  ;;  %v744_v52 = vmul.f32 %v742_v53, %v3520_v31  ;;  %v748_v21 = vmul.f32 %v746_v40, %v3526_v47 }
 0x190   : > { %v3008_v46 = vadd.f32 %v814_v39, %v802_v63  ;;  %v782_v45 = vrot.slane %v736_v33, 3  ;;  %v727_v11 = vmul.f32 %v726_v28, %v2321_v26  ;;  %v739_v17 = vmul.f32 %v738_v50, %v2414_v0 }
 0x191   : > { %v789_v13 = vadd.f32 %v751_v2, %v747_v36  ;;  %v728_v61 = vmul.f32 %v726_v28, %v3518_v23  ;;  %v740_v3 = vmul.f32 %v738_v50, %v3528_v41  ;;  %v790_v62 = vadd.f32 %v752_v12, %v748_v21  ;;  %v1522_v23 = vld [vmem:[#allocation6] sm:$0xff]  ;;  %v253_v41 = vld [vmem:[#allocation6 + $0x18] sm:$0x3f] }
 0x192   : > { %v723_v58 = vmul.f32 %v722_v20, %v2299_v4  ;;  %v785_v5 = vadd.f32 %v781_v60, %v731_v22  ;;  %v787_v35 = vadd.f32 %v743_v48, %v739_v17  ;;  %v724_v44 = vmul.f32 %v722_v20, %v3534_v6  ;;  %v1523_v4 = vld [vmem:[#allocation6 + $0x8] sm:$0xff] }
 0x193   : > { %v786_v31 = vadd.f32 %v782_v45, %v732_v57  ;;  %v788_v18 = vadd.f32 %v744_v52, %v740_v3  ;;  %vm488_vm7 = vcmp.lt.s32.totalorder %v3603_v8, 48  ;;  %v491_v38 = vrot.slane %v1522_v23, 7 }
 0x194   : > { %v777_v26 = vadd.f32 %v727_v11, %v723_v58  ;;  %v805_v0 = vadd.f32 %v789_v13, %v787_v35  ;;  %v778_v37 = vadd.f32 %v728_v61, %v724_v44  ;;  %v492_v63 = vrot.slane %v1523_v4, 7 }
 0x195   : > { %v806_v51 = vadd.f32 %v790_v62, %v788_v18  ;;  %vm601_vm8 = vcmp.lt.s32.totalorder %v3603_v8, 32  ;;  %vm710_vm9 = vcmp.lt.s32.totalorder %v3603_v8, 16  ;;  %v715_v14 = vrot.slane %v3037_v54, 1 }
 0x196   : > { %v803_v6 = vadd.f32 %v785_v5, %v777_v26  ;;  %v716_v34 = vrot.slane %v253_v41, 1  ;;  %v804_v10 = vadd.f32 %v786_v31, %v778_v37  ;;  %v821_v25 = vrot.slane %v3037_v54, 2 }
 0x197   : > { %v822_v32 = vrot.slane %v253_v41, 2  ;;  %vm931_vm10 = vcmp.lt.s32.totalorder %v3603_v8, 112  ;;  %v934_v55 = vrot.slane %v3037_v54, 3  ;;  %v935_v1 = vrot.slane %v253_v41, 3 }
 0x198   : > { %v815_v59 = vadd.f32 %v805_v0, %v803_v6  ;;  %v816_v39 = vadd.f32 %v806_v51, %v804_v10  ;;  %vm1044_vm11 = vcmp.lt.s32.totalorder %v3603_v8, 96  ;;  %v1047_v19 = vrot.slane %v3037_v54, 4 }
 0x199   : > { %v1048_v33 = vrot.slane %v253_v41, 4  ;;  %vm1157_vm12 = vcmp.lt.s32.totalorder %v3603_v8, 80  ;;  %v1161_v12 = vrot.slane %v253_v41, 5  ;;  %v3607_v6 = vlaneseq }
 0x19a   : > { %v819_v2 = vadd.f32 %v3006_v16, %v815_v59  ;;  %v820_v20 = vadd.f32 %v3008_v46, %v816_v39  ;;  %v1524_v39 = vld [vmem:[%s3606_s17] sm:$0xff] }
 0x19c   : > { %v825_v60 = vmul.f32 %v821_v25, %v819_v2  ;;  %v826_v57 = vmul.f32 %v822_v32, %v820_v20 }
 0x1b7   : > { %v3010_v42 = vpop.permute.xlu0 %484 }
 0x1b8   : > { %v3012_v7 = vpop.permute.xlu1 %486 }
 0x1b9   : > { %v490_v22 = vsel %vm488_vm7, %v3012_v7, %v3010_v42 }
 0x1ba   : > { %v495_v11 = vmul.f32 %v491_v38, %v490_v22 }
 0x1bb   : > { %v3016_v43 = vpop.permute.xlu0 %597 }
 0x1bc   : > { %v3018_v49 = vpop.permute.xlu1 %599 }
 0x1bd   : > { %v602_v53 = vsel %vm601_vm8, %v3016_v43, %v3018_v49  ;;  %v603_v40 = vsel %vm601_vm8, %v3018_v49, %v3016_v43 }
 0x1be   : > { %v604_v16 = vmul.f32 %v603_v40, %v3037_v54  ;;  %v605_v46 = vmul.f32 %v602_v53, %v253_v41 }
 0x1c0   : > { %v1166_v62 = vadd.f32 %v604_v16, %v495_v11 }
 0x1c3   : > { %v707_v29 = vpop.permute.xlu0 %706  ;;  %v709_v56 = vpop.permute.xlu1 %708 }
 0x1c4   : > { %v711_v9 = vsel %vm710_vm9, %v707_v29, %v709_v56  ;;  %v712_v27 = vsel %vm710_vm9, %v709_v56, %v707_v29  ;;  %v1160_v29 = vrot.slane %v3037_v54, 5  ;;  %v489_v56 = vsel %vm488_vm7, %v3010_v42, %v3012_v7 }
 0x1c5   : > { %v719_v43 = vmul.f32 %v715_v14, %v712_v27  ;;  %v720_v49 = vmul.f32 %v716_v34, %v711_v9  ;;  %v496_v17 = vmul.f32 %v492_v63, %v489_v56  ;;  %v1191_v14 = vshrl.u32 %v3607_v6, 7 }
 0x1c7   : > { %v1168_v13 = vadd.f32 %v825_v60, %v719_v43  ;;  %v1169_v42 = vadd.f32 %v826_v57, %v720_v49  ;;  %v1167_v58 = vadd.f32 %v605_v46, %v496_v17  ;;  %v1192_v34 = vsub.s32 0, %v1191_v14 }
 0x1c9   : > { %v1173_v54 = vadd.f32 %v1169_v42, %v1167_v58 }
 0x1d0   : > { %v928_v47 = vpop.permute.xlu0 %927 }
 0x1da   : > { %v930_v24 = vpop.permute.xlu1 %929 }
 0x1db   : > { %v932_v48 = vsel %vm931_vm10, %v928_v47, %v930_v24  ;;  %v933_v36 = vsel %vm931_vm10, %v930_v24, %v928_v47  ;;  %v1172_v24 = vadd.f32 %v1168_v13, %v1166_v62 }
 0x1dc   : > { %v938_v7 = vmul.f32 %v934_v55, %v932_v48  ;;  %v939_v61 = vmul.f32 %v935_v1, %v933_v36 }
 0x1e4   : > { %v1041_v15 = vpop.permute.xlu0 %1040 }
 0x1ec   : > { %v1043_v30 = vpop.permute.xlu1 %1042 }
 0x1ed   : > { %v1045_v28 = vsel %vm1044_vm11, %v1041_v15, %v1043_v30  ;;  %v1046_v50 = vsel %vm1044_vm11, %v1043_v30, %v1041_v15 }
 0x1ee   : > { %v1051_v52 = vmul.f32 %v1047_v19, %v1045_v28  ;;  %v1052_v21 = vmul.f32 %v1048_v33, %v1046_v50 }
 0x1f0   : > { %v1170_v44 = vadd.f32 %v1051_v52, %v938_v7  ;;  %v1171_v31 = vadd.f32 %v1052_v21, %v939_v61 }
 0x1f5   : > { %v1154_v45 = vpop.permute.xlu0 %1153 }
 0x1fc   : > { %v1156_v3 = vpop.permute.xlu1 %1155 }
 0x1fd   : > { %v1158_v5 = vsel %vm1157_vm12, %v1154_v45, %v1156_v3  ;;  %v1159_v35 = vsel %vm1157_vm12, %v1156_v3, %v1154_v45 }
 0x1fe   : > { %v1164_v18 = vmul.f32 %v1160_v29, %v1158_v5  ;;  %v1165_v47 = vmul.f32 %v1161_v12, %v1159_v35 }
 0x200   : > { %v1174_v26 = vadd.f32 %v1170_v44, %v1164_v18  ;;  %v1175_v0 = vadd.f32 %v1171_v31, %v1165_v47 }
 0x202   : > { %v1176_v23 = vadd.f32 %v1174_v26, %v1172_v24  ;;  %v1177_v38 = vadd.f32 %v1175_v0, %v1173_v54 }
 0x204   : > { %v1423_v41 = vmul.f32 -1.442695, %v1176_v23  ;;  %v1424_v37 = vmul.f32 -1.442695, %v1177_v38 }
 0x206   : > { %1514 = vpow2.f32 %v1423_v41 }
 0x207   : > { %1516 = vpow2.f32 %v1424_v37 }
 0x210   : > { %v1515_v51 = vpop.eup %1514 }
 0x211   : > { %v1517_v8 = vpop.eup %1516  ;;  %v1184_v4 = vadd.f32 1.0, %v1515_v51 }
 0x212   : > { %v1185_v63 = vadd.f32 1.0, %v1517_v8 }
 0x213   : > { %1518 = vrcp.f32 %v1184_v4 }
 0x214   : > { %1520 = vrcp.f32 %v1185_v63 }
 0x21d   : > { %v1519_v10 = vpop.eup %1518 }
 0x21e   : > { %v1521_v25 = vpop.eup %1520  ;;  %v1193_v59 = vrot.slane %v1519_v10, %v1192_v34 }
 0x21f   : > { %v1197_v32 = vrot.slane %v1521_v25, %v1192_v34 }
 0x221   : > { %v1200_v55 = vcombine.low %v1193_v59, %v1197_v32 }
 0x223   : > { %v1202_v1 = vmul.f32 %v1524_v39, %v1200_v55 }
 0x225   : > { %1203 = vst [vmem:[%s213_s25] sm:$0xff] %v1202_v1 }
 0x226   : > { %1609 = shalt.err (!%p1606_p2)
}
 0x227   : > { %s1610_s1 = scalar_lea.hbm %s3089_s6, 128  ;;  %s1614_s26 = scalar_lea.hbm %s3611_s24, 256 }
 0x228   : > { %p1611_p6 = scmp.ne.s32.totalorder %s3089_s6, %s1610_s1  ;;  %p1615_p9 = scmp.lt.u32.totalorder %s3089_s6, %s3611_s24 }
 0x229   : > { %p1616_p4 = scmp.lt.u32.totalorder %s1614_s26, %s1610_s1  ;;  %p1618_p0 = scmp.lt.u32.totalorder %s1610_s1, %s3089_s6 }
 0x22a   : > { %p1612_p7 = pnand %p1611_p6, %p3612_p11 }
 0x22b   : > { %p1617_p8 = por %p1616_p4, %p1615_p9 }
 0x22c   : > { %p1613_p12 = pneg %p1612_p7 }
 0x22d   : > { %p1619_p13 = por %p1618_p0, %p1617_p8 }
 0x22f   : > { %p1620_p3 = pnand %p1619_p13, %p1613_p12 }
 0x231   : > { %1623 = shalt.err (!%p1620_p3)
}
 0x232   : > { %1442 = dma.vmem_to_hbm [thread:$0]  (%p3612_p11), %s3091_s23, 128, %s3089_s6, %s1205_s22  }
 0x233 PF: > { %s3613_s3 = sld [smem:[#allocation14_spill]]  ;;  %s3614_s30 = sld [smem:[#allocation19_spill]] }
 0x234   : > { %s3615_s5 = sld [smem:[#allocation17_spill]] }
 0x239   : > { %s1231_s9 = sand.u32 1, %s3613_s3   ;;  %p3616_p5 = scmp.ne.s32.totalorder %s3614_s30, 0 }
 0x23a   : > { %p3617_p10 = scmp.ge.s32.totalorder %s3615_s5, 2  ;;  %s1232_s4 = scalar_lea.sflag [#allocation4], %s1231_s9 }
 0x23c   : > { %p1456_p1 = pnand %p3617_p10, %p3616_p5 }
 0x23e   : > { %1653 = dma.done.wait (!%p1456_p1), %s1232_s4, 128  }
 0x23f   : > { %1655 = vsyncadd (!%p1456_p1), %s1232_s4, 4294967168  ;;  %s3618_s15 = sld [smem:[#allocation20_spill]]  ;;  %s3619_s12 = sld [smem:[#allocation15_spill]] }
 0x240   : > { %s3620_s13 = sld [smem:[#allocation16_spill]]  ;;  %s3621_s14 = sld [smem:[#allocation21_spill]] }
 0x245   : > { %p18_p2 = scmp.ge.s32.totalorder %s3618_s15, 4  }
 0x247   :  { %20 = sbr.rel (!%p18_p2) target bundleno = 12 (0xc), region = 87 }
 0x24e   :  { %1237 = vsyncpa [#allocation3], 1 }
 0x24f   :  { %1239 = vsyncpa [#allocation3 + $0x1], 1 }
 0x250   :  { %1240 = vsyncpa [#allocation8], 1 }
 0x251   :  { %1242 = vsyncpa [#allocation8 + $0x1], 1 }
 0x252   :  { %1243 = vsyncpa [#allocation4], 1 }
 0x253   :  { %1245 = vsyncpa [#allocation4 + $0x1], 1 }
 0x254   :  { %1246 = vsyncpa [#allocation5], 1 }
 0x255   :  { %1248 = vsyncpa [#allocation5 + $0x1], 1 }

</bundles_post_ra>
